<compile_context>
chip_gen: v5e
topology: v5e:2x2
jax: 0.10.0
libtpu: 0.0.40
codegen_flags: <defaults>
</compile_context>

<pallas_src>
import functools

import jax
import jax.numpy as jnp
import numpy as np
from jax import lax
from jax.experimental import pallas as pl
from jax.experimental.pallas import tpu as pltpu

_LEVEL_PAD = 8  # each prompt level padded to 8 rows (one sublane group)


def _conditional_prompt_kernel(
    vis_ref,                                        # (Bb, C, HW)  native NCHW tile
    pool_ref,                                       # (Pp, HW)     level-padded pooling matrix
    w_in0_ref, b_in0_ref, w_out0_ref, b_out0_ref,   # level-0 MLP
    w_in1_ref, b_in1_ref, w_out1_ref, b_out1_ref,   # level-1 MLP
    lang_ref,                                       # (Pp, T)      level-padded lang prompts
    gamma_ref, beta_ref,                            # (1, T)       LayerNorm affine
    out_ref,                                        # (Bb, P, T)
    *, block_b: int, p0: int, p1: int,
):
    pad = _LEVEL_PAD
    C = vis_ref.shape[1]
    HW = vis_ref.shape[2]
    Pp = pool_ref.shape[0]
    T = lang_ref.shape[1]

    # Adaptive average pooling of both prompt levels for the whole batch block
    # as a single batched MXU contraction; vis stays in its native (C, HW)
    # layout so no large transpose is ever materialized.
    pool = jnp.broadcast_to(pool_ref[...][None], (block_b, Pp, HW))
    pooled = jnp.einsum("bpx,bcx->bpc", pool, vis_ref[...],
                        preferred_element_type=jnp.float32)        # (Bb, Pp, C) f32

    # Sublane-aligned level split (each level owns 8 padded rows), then merge
    # the batch block into the row dim so each level's MLP is one matmul pair.
    x0 = pooled[:, :pad, :].reshape(block_b * pad, C)
    x1 = pooled[:, pad:, :].reshape(block_b * pad, C)

    def mlp(x, w_in_ref, b_in_ref, w_out_ref, b_out_ref):
        h = jnp.dot(x, w_in_ref[...], preferred_element_type=jnp.float32)
        h = jnp.maximum(h + b_in_ref[...], 0.0)                    # ReLU
        return jnp.dot(h, w_out_ref[...],
                       preferred_element_type=jnp.float32) + b_out_ref[...]

    h0 = mlp(x0, w_in0_ref, b_in0_ref, w_out0_ref, b_out0_ref).reshape(block_b, pad, T)
    h1 = mlp(x1, w_in1_ref, b_in1_ref, w_out1_ref, b_out1_ref).reshape(block_b, pad, T)

    lang = lang_ref[...]
    gamma = gamma_ref[...]
    beta = beta_ref[...]

    def add_layernorm(h, lang_lvl):                                # f32 throughout
        x = h + lang_lvl[None, :, :]                               # broadcast, no tile
        mu = jnp.mean(x, axis=-1, keepdims=True)
        xc = x - mu
        var = jnp.mean(xc * xc, axis=-1, keepdims=True)
        return xc * lax.rsqrt(var + 1e-5) * gamma + beta

    y0 = add_layernorm(h0, lang[:pad])                             # (Bb, pad, T)
    y1 = add_layernorm(h1, lang[pad:])                             # (Bb, pad, T)

    # Exactly two stores per grid step; the zero-padded rows are dropped here.
    out_ref[:, :p0, :] = y0[:, :p0, :].astype(out_ref.dtype)
    out_ref[:, p0:, :] = y1[:, :p1, :].astype(out_ref.dtype)


def _make_pool_matrix_padded(H, W, levels, pad=_LEVEL_PAD):
    """AdaptiveAvgPool2d((l,l)) for every level as rows of a (len(levels)*pad, H*W)
    matrix; each level's l*l rows are zero-padded to `pad` rows so downstream
    slices stay sublane-aligned (built once in numpy, no runtime cost)."""
    # TODO(synk): assumes H % l == 0 and W % l == 0; torch AdaptiveAvgPool2d uses
    # variable window sizes for non-divisible spatial dims.
    mat = np.zeros((len(levels) * pad, H * W), np.float32)
    for li, l in enumerate(levels):
        assert l * l <= pad and H % l == 0 and W % l == 0
        bh, bw = H // l, W // l
        for i in range(l):
            for j in range(l):
                m = np.zeros((H, W), np.float32)
                m[i * bh:(i + 1) * bh, j * bw:(j + 1) * bw] = 1.0 / (bh * bw)
                mat[li * pad + i * l + j] = m.reshape(-1)
    return jnp.asarray(mat)


def _pick_block_b(B, bytes_per_batch):
    """Largest batch block whose double-buffered vis tile stays <= 16 MiB while
    keeping >= min(4, B) grid steps (pipelining + both v7x TensorCores)."""
    best = 1
    for cand in range(1, B + 1):
        if B % cand:
            continue
        if B // cand >= min(4, B) and 2 * cand * bytes_per_batch <= (16 << 20):
            best = cand
    return best


def conditional_prompt_pallas(vis, l_mask, params, prompt_levels=(1, 2),
                              block_b=None):
    """vis: [B, C, H, W] last-stage Swin feature (native layout); l_mask: [B, N_l]."""
    assert len(prompt_levels) == 2, "kernel is specialized for 2 prompt levels"
    B, C, H, W = vis.shape
    HW = H * W
    P, T = params["lang"].shape
    p0 = prompt_levels[0] ** 2
    p1 = prompt_levels[1] ** 2
    assert P == p0 + p1 and p0 <= _LEVEL_PAD and p1 <= _LEVEL_PAD
    Pp = 2 * _LEVEL_PAD

    # Free metadata reshape of the native NCHW tensor; no transpose, no cast.
    vis3 = vis.reshape(B, C, HW)

    if block_b is None:
        block_b = _pick_block_b(B, HW * C * vis3.dtype.itemsize)
    assert B % block_b == 0
    n_blocks = B // block_b

    pool_pad = _make_pool_matrix_padded(H, W, prompt_levels)

    f32 = jnp.float32
    lang_pad = jnp.zeros((Pp, T), f32)
    lang_pad = lang_pad.at[:p0].set(params["lang"][:p0].astype(f32))
    lang_pad = lang_pad.at[_LEVEL_PAD:_LEVEL_PAD + p1].set(params["lang"][p0:].astype(f32))

    const_args = (
        pool_pad,
        params["w_in0"].astype(f32), params["b_in0"].astype(f32),
        params["w_out0"].astype(f32), params["b_out0"].astype(f32),
        params["w_in1"].astype(f32), params["b_in1"].astype(f32),
        params["w_out1"].astype(f32), params["b_out1"].astype(f32),
        lang_pad, params["gamma"].astype(f32), params["beta"].astype(f32),
    )

    # VMEM budget from actual tile bytes (review: never blanket-request 64 MiB;
    # v7x only has 64 MiB per TensorCore).  Double-buffered vis/out, 2x consts
    # as slack, plus headroom for Mosaic internal scratch; capped at 48 MiB.
    vis_tile_bytes = block_b * HW * C * vis3.dtype.itemsize
    out_tile_bytes = block_b * P * T * 4
    const_bytes = sum(int(a.size) * a.dtype.itemsize for a in const_args)
    vmem_bytes = 2 * vis_tile_bytes + 2 * out_tile_bytes + 2 * const_bytes + (4 << 20)
    vmem_bytes = int(min(max(vmem_bytes, 16 << 20), 48 << 20))

    kernel = functools.partial(_conditional_prompt_kernel,
                               block_b=block_b, p0=p0, p1=p1)

    def run(single_buffer_consts):
        def const_spec(shape):
            zeros = (0,) * len(shape)

            def idx(b):
                return zeros

            if single_buffer_consts:
                # Constant blocks (index_map never changes) don't need double
                # buffers; frees VMEM for larger vis tiles at real model sizes.
                return pl.BlockSpec(shape, idx, pipeline_mode=pl.Buffered(1))
            return pl.BlockSpec(shape, idx)

        grid_spec = pltpu.PrefetchScalarGridSpec(
            num_scalar_prefetch=0,
            grid=(n_blocks,),
            in_specs=[pl.BlockSpec((block_b, C, HW), lambda b: (b, 0, 0))]
                     + [const_spec(a.shape) for a in const_args],
            out_specs=pl.BlockSpec((block_b, P, T), lambda b: (b, 0, 0)),
        )
        return pl.pallas_call(
            kernel,
            out_shape=jax.ShapeDtypeStruct((B, P, T), jnp.float32),
            grid_spec=grid_spec,
            compiler_params=pltpu.CompilerParams(
                dimension_semantics=("parallel",),
                vmem_limit_bytes=vmem_bytes,
            ),
        )(vis3, *const_args)

    try:
        prompts = run(True)
    except Exception:  # jax version without pipeline_mode/Buffered on pallas_call
        prompts = run(False)

    # Glue from the module: l_mask = cat([l_mask, ones(B, num_prompts)], dim=1)
    ones = jnp.ones((B, P), dtype=l_mask.dtype)
    l_mask_ext = jnp.concatenate([l_mask, ones], axis=1)
    return prompts, l_mask_ext


def _reference(vis, l_mask, params, prompt_levels=(1, 2)):
    """Pure-JAX f32 reference matching the PyTorch ConditionalPrompt.forward."""
    B, C, H, W = vis.shape
    outs = []
    for li, l in enumerate(prompt_levels):
        p = vis.reshape(B, C, l, H // l, l, W // l).mean(axis=(3, 5))   # (B,C,l,l)
        p = p.reshape(B, C, l * l).transpose(0, 2, 1)                   # (B,l*l,C)
        h = jax.nn.relu(p @ params[f"w_in{li}"] + params[f"b_in{li}"])
        h = h @ params[f"w_out{li}"] + params[f"b_out{li}"]
        outs.append(h)
    vis_prompts = jnp.concatenate(outs, axis=1)
    x = params["lang"][None] + vis_prompts
    mu = x.mean(-1, keepdims=True)
    var = ((x - mu) ** 2).mean(-1, keepdims=True)
    y = (x - mu) / jnp.sqrt(var + 1e-5) * params["gamma"] + params["beta"]
    P = params["lang"].shape[0]
    mask = jnp.concatenate([l_mask, jnp.ones((B, P), l_mask.dtype)], axis=1)
    return y, mask


if __name__ == "__main__":
    key = jax.random.PRNGKey(0)
    B, C, H, W = 2, 32, 16, 16      # vis_dim = max(channels) = 32 (small synthetic)
    T = 128                         # text_dim (768 in the real model, small here)
    N_l = 8
    prompt_levels = (1, 2)
    P = sum(l * l for l in prompt_levels)   # num_prompts = 5

    keys = jax.random.split(key, 12)
    # stands in for vis_outs[-1] from the Swin backbone
    vis = jax.random.normal(keys[0], (B, C, H, W), jnp.float32)
    l_mask = (jax.random.uniform(keys[1], (B, N_l)) > 0.3).astype(jnp.float32)

    params = {
        # Linear weights stored as (in, out); trunc_normal(std=0.02) ~ 0.02 * normal
        "w_in0": 0.02 * jax.random.normal(keys[2], (C, T), jnp.float32),
        "b_in0": 0.01 * jax.random.normal(keys[3], (1, T), jnp.float32),
        "w_out0": 0.02 * jax.random.normal(keys[4], (T, T), jnp.float32),
        "b_out0": 0.01 * jax.random.normal(keys[5], (1, T), jnp.float32),
        "w_in1": 0.02 * jax.random.normal(keys[6], (C, T), jnp.float32),
        "b_in1": 0.01 * jax.random.normal(keys[7], (1, T), jnp.float32),
        "w_out1": 0.02 * jax.random.normal(keys[8], (T, T), jnp.float32),
        "b_out1": 0.01 * jax.random.normal(keys[9], (1, T), jnp.float32),
        "lang": jax.random.normal(keys[10], (P, T), jnp.float32),          # nn.Embedding weight
        "gamma": 1.0 + 0.1 * jax.random.normal(keys[11], (1, T), jnp.float32),  # LayerNorm weight
        "beta": jnp.zeros((1, T), jnp.float32),                            # LayerNorm bias
    }

    ref_prompts, ref_mask = _reference(vis, l_mask, params, prompt_levels)

    # Default block_b: block_b=1 here -> 2 pipelined grid steps (one per v7x TC);
    # at real batch sizes the selector keeps >= 4 steps for DMA/compute overlap.
    prompts, mask = conditional_prompt_pallas(vis, l_mask, params, prompt_levels)
    prompts = jax.block_until_ready(prompts)
    mask = jax.block_until_ready(mask)
    assert prompts.shape == (B, P, T) and mask.shape == (B, N_l + P)
    assert jnp.allclose(prompts, ref_prompts, atol=2e-3, rtol=2e-3)
    assert jnp.allclose(mask, ref_mask)

    # Batch-merged path (block_b > 1) to exercise the multi-batch reshapes.
    prompts2, mask2 = conditional_prompt_pallas(vis, l_mask, params,
                                                prompt_levels, block_b=B)
    prompts2 = jax.block_until_ready(prompts2)
    assert jnp.allclose(prompts2, ref_prompts, atol=2e-3, rtol=2e-3)
    assert jnp.allclose(mask2, ref_mask)

    print("KERNEL_OK")
</pallas_src>

<mosaic_0001>
module attributes {stable_mosaic.version = 11 : i64} {
  func.func @_conditional_prompt_kernel(%arg0: i32, %arg1: memref<1x32x256xf32, #tpu.memory_space<vmem>>, %arg2: memref<16x256xf32, #tpu.memory_space<vmem>>, %arg3: memref<32x128xf32, #tpu.memory_space<vmem>>, %arg4: memref<1x128xf32, #tpu.memory_space<vmem>>, %arg5: memref<128x128xf32, #tpu.memory_space<vmem>>, %arg6: memref<1x128xf32, #tpu.memory_space<vmem>>, %arg7: memref<32x128xf32, #tpu.memory_space<vmem>>, %arg8: memref<1x128xf32, #tpu.memory_space<vmem>>, %arg9: memref<128x128xf32, #tpu.memory_space<vmem>>, %arg10: memref<1x128xf32, #tpu.memory_space<vmem>>, %arg11: memref<16x128xf32, #tpu.memory_space<vmem>>, %arg12: memref<1x128xf32, #tpu.memory_space<vmem>>, %arg13: memref<1x128xf32, #tpu.memory_space<vmem>>, %arg14: memref<1x5x128xf32, #tpu.memory_space<vmem>>) attributes {dimension_semantics = [#tpu.dimension_semantics<parallel>], iteration_bounds = array<i64: 2>, scalar_prefetch = 0 : i64, scratch_operands = 0 : i64, tpu.core_type = #tpu.core_type<tc>, window_params = [{transform_indices = @transform_0, window_bounds = array<i64: 1, 32, 256>}, {pipeline_mode = #tpu.pipeline_mode<synchronous>, transform_indices = @transform_1, window_bounds = array<i64: 16, 256>}, {pipeline_mode = #tpu.pipeline_mode<synchronous>, transform_indices = @transform_2, window_bounds = array<i64: 32, 128>}, {pipeline_mode = #tpu.pipeline_mode<synchronous>, transform_indices = @transform_3, window_bounds = array<i64: 1, 128>}, {pipeline_mode = #tpu.pipeline_mode<synchronous>, transform_indices = @transform_4, window_bounds = array<i64: 128, 128>}, {pipeline_mode = #tpu.pipeline_mode<synchronous>, transform_indices = @transform_5, window_bounds = array<i64: 1, 128>}, {pipeline_mode = #tpu.pipeline_mode<synchronous>, transform_indices = @transform_6, window_bounds = array<i64: 32, 128>}, {pipeline_mode = #tpu.pipeline_mode<synchronous>, transform_indices = @transform_7, window_bounds = array<i64: 1, 128>}, {pipeline_mode = #tpu.pipeline_mode<synchronous>, transform_indices = @transform_8, window_bounds = array<i64: 128, 128>}, {pipeline_mode = #tpu.pipeline_mode<synchronous>, transform_indices = @transform_9, window_bounds = array<i64: 1, 128>}, {pipeline_mode = #tpu.pipeline_mode<synchronous>, transform_indices = @transform_10, window_bounds = array<i64: 16, 128>}, {pipeline_mode = #tpu.pipeline_mode<synchronous>, transform_indices = @transform_11, window_bounds = array<i64: 1, 128>}, {pipeline_mode = #tpu.pipeline_mode<synchronous>, transform_indices = @transform_12, window_bounds = array<i64: 1, 128>}, {transform_indices = @transform_13, window_bounds = array<i64: 1, 5, 128>}]} {
    %c0 = arith.constant 0 : index
    %c0_0 = arith.constant 0 : index
    %0 = vector.load %arg2[%c0, %c0_0] : memref<16x256xf32, #tpu.memory_space<vmem>>, vector<16x256xf32>
    %1 = vector.shape_cast %0 : vector<16x256xf32> to vector<1x16x256xf32>
    %c0_1 = arith.constant 0 : index
    %c0_2 = arith.constant 0 : index
    %c0_3 = arith.constant 0 : index
    %2 = vector.load %arg1[%c0_1, %c0_2, %c0_3] : memref<1x32x256xf32, #tpu.memory_space<vmem>>, vector<1x32x256xf32>
    "tpu.trace_start"() <{level = 10 : i32, message = "bpx,bcx->bpc"}> : () -> ()
    %cst = arith.constant dense<0.000000e+00> : vector<1x16x32xf32>
    %3 = tpu.matmul %1, %2, %cst {dimension_numbers = #tpu.dot_dimension_numbers<[2], [2], [1], [1], [0, 0, 0, 1, 1, 1], [0], [0]>} : vector<1x16x256xf32>, vector<1x32x256xf32>, vector<1x16x32xf32> -> vector<1x16x32xf32>
    "tpu.trace_stop"() : () -> ()
    %4 = vector.extract_strided_slice %3 {offsets = [0, 0, 0], sizes = [1, 8, 32], strides = [1, 1, 1]} : vector<1x16x32xf32> to vector<1x8x32xf32>
    %5 = vector.shape_cast %4 : vector<1x8x32xf32> to vector<8x32xf32>
    %6 = vector.extract_strided_slice %3 {offsets = [0, 8, 0], sizes = [1, 8, 32], strides = [1, 1, 1]} : vector<1x16x32xf32> to vector<1x8x32xf32>
    %7 = vector.shape_cast %6 : vector<1x8x32xf32> to vector<8x32xf32>
    %c0_4 = arith.constant 0 : index
    %c0_5 = arith.constant 0 : index
    %8 = vector.load %arg3[%c0_4, %c0_5] : memref<32x128xf32, #tpu.memory_space<vmem>>, vector<32x128xf32>
    %cst_6 = arith.constant dense<0.000000e+00> : vector<8x128xf32>
    %9 = tpu.matmul %5, %8, %cst_6 {dimension_numbers = #tpu.dot_dimension_numbers<[1], [0], [0], [1], [0, 0, 1, 1], [], []>} : vector<8x32xf32>, vector<32x128xf32>, vector<8x128xf32> -> vector<8x128xf32>
    %c0_7 = arith.constant 0 : index
    %c0_8 = arith.constant 0 : index
    %10 = vector.load %arg4[%c0_7, %c0_8] : memref<1x128xf32, #tpu.memory_space<vmem>>, vector<1x128xf32>
    %11 = vector.broadcast %10 : vector<1x128xf32> to vector<8x128xf32>
    %12 = arith.addf %9, %11 : vector<8x128xf32>
    %cst_9 = arith.constant 0.000000e+00 : f32
    %13 = vector.broadcast %cst_9 : f32 to vector<8x128xf32>
    %14 = arith.maximumf %12, %13 : vector<8x128xf32>
    %c0_10 = arith.constant 0 : index
    %c0_11 = arith.constant 0 : index
    %15 = vector.load %arg5[%c0_10, %c0_11] : memref<128x128xf32, #tpu.memory_space<vmem>>, vector<128x128xf32>
    %cst_12 = arith.constant dense<0.000000e+00> : vector<8x128xf32>
    %16 = tpu.matmul %14, %15, %cst_12 {dimension_numbers = #tpu.dot_dimension_numbers<[1], [0], [0], [1], [0, 0, 1, 1], [], []>} : vector<8x128xf32>, vector<128x128xf32>, vector<8x128xf32> -> vector<8x128xf32>
    %c0_13 = arith.constant 0 : index
    %c0_14 = arith.constant 0 : index
    %17 = vector.load %arg6[%c0_13, %c0_14] : memref<1x128xf32, #tpu.memory_space<vmem>>, vector<1x128xf32>
    %18 = vector.broadcast %17 : vector<1x128xf32> to vector<8x128xf32>
    %19 = arith.addf %16, %18 : vector<8x128xf32>
    %20 = vector.shape_cast %19 : vector<8x128xf32> to vector<1x8x128xf32>
    %c0_15 = arith.constant 0 : index
    %c0_16 = arith.constant 0 : index
    %21 = vector.load %arg7[%c0_15, %c0_16] : memref<32x128xf32, #tpu.memory_space<vmem>>, vector<32x128xf32>
    %cst_17 = arith.constant dense<0.000000e+00> : vector<8x128xf32>
    %22 = tpu.matmul %7, %21, %cst_17 {dimension_numbers = #tpu.dot_dimension_numbers<[1], [0], [0], [1], [0, 0, 1, 1], [], []>} : vector<8x32xf32>, vector<32x128xf32>, vector<8x128xf32> -> vector<8x128xf32>
    %c0_18 = arith.constant 0 : index
    %c0_19 = arith.constant 0 : index
    %23 = vector.load %arg8[%c0_18, %c0_19] : memref<1x128xf32, #tpu.memory_space<vmem>>, vector<1x128xf32>
    %24 = vector.broadcast %23 : vector<1x128xf32> to vector<8x128xf32>
    %25 = arith.addf %22, %24 : vector<8x128xf32>
    %cst_20 = arith.constant 0.000000e+00 : f32
    %26 = vector.broadcast %cst_20 : f32 to vector<8x128xf32>
    %27 = arith.maximumf %25, %26 : vector<8x128xf32>
    %c0_21 = arith.constant 0 : index
    %c0_22 = arith.constant 0 : index
    %28 = vector.load %arg9[%c0_21, %c0_22] : memref<128x128xf32, #tpu.memory_space<vmem>>, vector<128x128xf32>
    %cst_23 = arith.constant dense<0.000000e+00> : vector<8x128xf32>
    %29 = tpu.matmul %27, %28, %cst_23 {dimension_numbers = #tpu.dot_dimension_numbers<[1], [0], [0], [1], [0, 0, 1, 1], [], []>} : vector<8x128xf32>, vector<128x128xf32>, vector<8x128xf32> -> vector<8x128xf32>
    %c0_24 = arith.constant 0 : index
    %c0_25 = arith.constant 0 : index
    %30 = vector.load %arg10[%c0_24, %c0_25] : memref<1x128xf32, #tpu.memory_space<vmem>>, vector<1x128xf32>
    %31 = vector.broadcast %30 : vector<1x128xf32> to vector<8x128xf32>
    %32 = arith.addf %29, %31 : vector<8x128xf32>
    %33 = vector.shape_cast %32 : vector<8x128xf32> to vector<1x8x128xf32>
    %c0_26 = arith.constant 0 : index
    %c0_27 = arith.constant 0 : index
    %34 = vector.load %arg11[%c0_26, %c0_27] : memref<16x128xf32, #tpu.memory_space<vmem>>, vector<16x128xf32>
    %c0_28 = arith.constant 0 : index
    %c0_29 = arith.constant 0 : index
    %35 = vector.load %arg12[%c0_28, %c0_29] : memref<1x128xf32, #tpu.memory_space<vmem>>, vector<1x128xf32>
    %c0_30 = arith.constant 0 : index
    %c0_31 = arith.constant 0 : index
    %36 = vector.load %arg13[%c0_30, %c0_31] : memref<1x128xf32, #tpu.memory_space<vmem>>, vector<1x128xf32>
    %37 = vector.extract_strided_slice %34 {offsets = [0, 0], sizes = [8, 128], strides = [1, 1]} : vector<16x128xf32> to vector<8x128xf32>
    %38 = vector.shape_cast %37 : vector<8x128xf32> to vector<1x8x128xf32>
    %39 = arith.addf %20, %38 : vector<1x8x128xf32>
    %cst_32 = arith.constant dense<0.000000e+00> : vector<1x8xf32>
    %40 = vector.multi_reduction <add>, %39, %cst_32 [2] : vector<1x8x128xf32> to vector<1x8xf32>
    %41 = vector.shape_cast %40 : vector<1x8xf32> to vector<1x8x1xf32>
    %cst_33 = arith.constant 1.280000e+02 : f32
    %42 = vector.broadcast %cst_33 : f32 to vector<1x8x1xf32>
    %43 = arith.divf %41, %42 : vector<1x8x1xf32>
    %44 = vector.broadcast %43 : vector<1x8x1xf32> to vector<1x8x128xf32>
    %45 = arith.subf %39, %44 : vector<1x8x128xf32>
    %46 = arith.mulf %45, %45 : vector<1x8x128xf32>
    %cst_34 = arith.constant dense<0.000000e+00> : vector<1x8xf32>
    %47 = vector.multi_reduction <add>, %46, %cst_34 [2] : vector<1x8x128xf32> to vector<1x8xf32>
    %48 = vector.shape_cast %47 : vector<1x8xf32> to vector<1x8x1xf32>
    %cst_35 = arith.constant 1.280000e+02 : f32
    %49 = vector.broadcast %cst_35 : f32 to vector<1x8x1xf32>
    %50 = arith.divf %48, %49 : vector<1x8x1xf32>
    %cst_36 = arith.constant 9.99999974E-6 : f32
    %51 = vector.broadcast %cst_36 : f32 to vector<1x8x1xf32>
    %52 = arith.addf %50, %51 : vector<1x8x1xf32>
    %53 = math.rsqrt %52 : vector<1x8x1xf32>
    %54 = vector.broadcast %53 : vector<1x8x1xf32> to vector<1x8x128xf32>
    %55 = arith.mulf %45, %54 : vector<1x8x128xf32>
    %56 = vector.shape_cast %35 : vector<1x128xf32> to vector<1x1x128xf32>
    %57 = vector.broadcast %56 : vector<1x1x128xf32> to vector<1x8x128xf32>
    %58 = arith.mulf %55, %57 : vector<1x8x128xf32>
    %59 = vector.shape_cast %36 : vector<1x128xf32> to vector<1x1x128xf32>
    %60 = vector.broadcast %59 : vector<1x1x128xf32> to vector<1x8x128xf32>
    %61 = arith.addf %58, %60 : vector<1x8x128xf32>
    %62 = vector.extract_strided_slice %34 {offsets = [8, 0], sizes = [8, 128], strides = [1, 1]} : vector<16x128xf32> to vector<8x128xf32>
    %63 = vector.shape_cast %62 : vector<8x128xf32> to vector<1x8x128xf32>
    %64 = arith.addf %33, %63 : vector<1x8x128xf32>
    %cst_37 = arith.constant dense<0.000000e+00> : vector<1x8xf32>
    %65 = vector.multi_reduction <add>, %64, %cst_37 [2] : vector<1x8x128xf32> to vector<1x8xf32>
    %66 = vector.shape_cast %65 : vector<1x8xf32> to vector<1x8x1xf32>
    %cst_38 = arith.constant 1.280000e+02 : f32
    %67 = vector.broadcast %cst_38 : f32 to vector<1x8x1xf32>
    %68 = arith.divf %66, %67 : vector<1x8x1xf32>
    %69 = vector.broadcast %68 : vector<1x8x1xf32> to vector<1x8x128xf32>
    %70 = arith.subf %64, %69 : vector<1x8x128xf32>
    %71 = arith.mulf %70, %70 : vector<1x8x128xf32>
    %cst_39 = arith.constant dense<0.000000e+00> : vector<1x8xf32>
    %72 = vector.multi_reduction <add>, %71, %cst_39 [2] : vector<1x8x128xf32> to vector<1x8xf32>
    %73 = vector.shape_cast %72 : vector<1x8xf32> to vector<1x8x1xf32>
    %cst_40 = arith.constant 1.280000e+02 : f32
    %74 = vector.broadcast %cst_40 : f32 to vector<1x8x1xf32>
    %75 = arith.divf %73, %74 : vector<1x8x1xf32>
    %cst_41 = arith.constant 9.99999974E-6 : f32
    %76 = vector.broadcast %cst_41 : f32 to vector<1x8x1xf32>
    %77 = arith.addf %75, %76 : vector<1x8x1xf32>
    %78 = math.rsqrt %77 : vector<1x8x1xf32>
    %79 = vector.broadcast %78 : vector<1x8x1xf32> to vector<1x8x128xf32>
    %80 = arith.mulf %70, %79 : vector<1x8x128xf32>
    %81 = vector.shape_cast %35 : vector<1x128xf32> to vector<1x1x128xf32>
    %82 = vector.broadcast %81 : vector<1x1x128xf32> to vector<1x8x128xf32>
    %83 = arith.mulf %80, %82 : vector<1x8x128xf32>
    %84 = vector.shape_cast %36 : vector<1x128xf32> to vector<1x1x128xf32>
    %85 = vector.broadcast %84 : vector<1x1x128xf32> to vector<1x8x128xf32>
    %86 = arith.addf %83, %85 : vector<1x8x128xf32>
    %87 = vector.extract_strided_slice %61 {offsets = [0, 0, 0], sizes = [1, 1, 128], strides = [1, 1, 1]} : vector<1x8x128xf32> to vector<1x1x128xf32>
    %c0_42 = arith.constant 0 : index
    %c0_43 = arith.constant 0 : index
    %c0_44 = arith.constant 0 : index
    %88 = vector.load %arg14[%c0_42, %c0_43, %c0_44] : memref<1x5x128xf32, #tpu.memory_space<vmem>>, vector<1x1x128xf32>
    tpu.vector_store %arg14[%c0_42, %c0_43, %c0_44], %87 {strides = array<i32>} : memref<1x5x128xf32, #tpu.memory_space<vmem>>, vector<1x1x128xf32>,
    %89 = vector.extract_strided_slice %86 {offsets = [0, 0, 0], sizes = [1, 4, 128], strides = [1, 1, 1]} : vector<1x8x128xf32> to vector<1x4x128xf32>
    %c0_45 = arith.constant 0 : index
    %c1 = arith.constant 1 : index
    %c0_46 = arith.constant 0 : index
    %90 = vector.load %arg14[%c0_45, %c1, %c0_46] : memref<1x5x128xf32, #tpu.memory_space<vmem>>, vector<1x4x128xf32>
    tpu.vector_store %arg14[%c0_45, %c1, %c0_46], %89 {strides = array<i32>} : memref<1x5x128xf32, #tpu.memory_space<vmem>>, vector<1x4x128xf32>,
    return
  }
  func.func @transform_0(%arg0: i32) -> (i32, i32, i32) {
    %c0_i32 = arith.constant 0 : i32
    %c0_i32_0 = arith.constant 0 : i32
    %c0_i32_1 = arith.constant 0 : i32
    return %arg0, %c0_i32, %c0_i32_0 : i32, i32, i32
  }
  func.func @transform_1(%arg0: i32) -> (i32, i32) {
    %c0_i32 = arith.constant 0 : i32
    %c0_i32_0 = arith.constant 0 : i32
    %c0_i32_1 = arith.constant 0 : i32
    return %c0_i32, %c0_i32_0 : i32, i32
  }
  func.func @transform_2(%arg0: i32) -> (i32, i32) {
    %c0_i32 = arith.constant 0 : i32
    %c0_i32_0 = arith.constant 0 : i32
    %c0_i32_1 = arith.constant 0 : i32
    return %c0_i32, %c0_i32_0 : i32, i32
  }
  func.func @transform_3(%arg0: i32) -> (i32, i32) {
    %c0_i32 = arith.constant 0 : i32
    %c0_i32_0 = arith.constant 0 : i32
    %c0_i32_1 = arith.constant 0 : i32
    return %c0_i32, %c0_i32_0 : i32, i32
  }
  func.func @transform_4(%arg0: i32) -> (i32, i32) {
    %c0_i32 = arith.constant 0 : i32
    %c0_i32_0 = arith.constant 0 : i32
    %c0_i32_1 = arith.constant 0 : i32
    return %c0_i32, %c0_i32_0 : i32, i32
  }
  func.func @transform_5(%arg0: i32) -> (i32, i32) {
    %c0_i32 = arith.constant 0 : i32
    %c0_i32_0 = arith.constant 0 : i32
    %c0_i32_1 = arith.constant 0 : i32
    return %c0_i32, %c0_i32_0 : i32, i32
  }
  func.func @transform_6(%arg0: i32) -> (i32, i32) {
    %c0_i32 = arith.constant 0 : i32
    %c0_i32_0 = arith.constant 0 : i32
    %c0_i32_1 = arith.constant 0 : i32
    return %c0_i32, %c0_i32_0 : i32, i32
  }
  func.func @transform_7(%arg0: i32) -> (i32, i32) {
    %c0_i32 = arith.constant 0 : i32
    %c0_i32_0 = arith.constant 0 : i32
    %c0_i32_1 = arith.constant 0 : i32
    return %c0_i32, %c0_i32_0 : i32, i32
  }
  func.func @transform_8(%arg0: i32) -> (i32, i32) {
    %c0_i32 = arith.constant 0 : i32
    %c0_i32_0 = arith.constant 0 : i32
    %c0_i32_1 = arith.constant 0 : i32
    return %c0_i32, %c0_i32_0 : i32, i32
  }
  func.func @transform_9(%arg0: i32) -> (i32, i32) {
    %c0_i32 = arith.constant 0 : i32
    %c0_i32_0 = arith.constant 0 : i32
    %c0_i32_1 = arith.constant 0 : i32
    return %c0_i32, %c0_i32_0 : i32, i32
  }
  func.func @transform_10(%arg0: i32) -> (i32, i32) {
    %c0_i32 = arith.constant 0 : i32
    %c0_i32_0 = arith.constant 0 : i32
    %c0_i32_1 = arith.constant 0 : i32
    return %c0_i32, %c0_i32_0 : i32, i32
  }
  func.func @transform_11(%arg0: i32) -> (i32, i32) {
    %c0_i32 = arith.constant 0 : i32
    %c0_i32_0 = arith.constant 0 : i32
    %c0_i32_1 = arith.constant 0 : i32
    return %c0_i32, %c0_i32_0 : i32, i32
  }
  func.func @transform_12(%arg0: i32) -> (i32, i32) {
    %c0_i32 = arith.constant 0 : i32
    %c0_i32_0 = arith.constant 0 : i32
    %c0_i32_1 = arith.constant 0 : i32
    return %c0_i32, %c0_i32_0 : i32, i32
  }
  func.func @transform_13(%arg0: i32) -> (i32, i32, i32) {
    %c0_i32 = arith.constant 0 : i32
    %c0_i32_0 = arith.constant 0 : i32
    %c0_i32_1 = arith.constant 0 : i32
    return %arg0, %c0_i32, %c0_i32_0 : i32, i32, i32
  }
}

module attributes {stable_mosaic.version = 11 : i64} {
  func.func @_conditional_prompt_kernel(%arg0: i32, %arg1: memref<1x32x256xf32, #tpu.memory_space<vmem>>, %arg2: memref<16x256xf32, #tpu.memory_space<vmem>>, %arg3: memref<32x128xf32, #tpu.memory_space<vmem>>, %arg4: memref<1x128xf32, #tpu.memory_space<vmem>>, %arg5: memref<128x128xf32, #tpu.memory_space<vmem>>, %arg6: memref<1x128xf32, #tpu.memory_space<vmem>>, %arg7: memref<32x128xf32, #tpu.memory_space<vmem>>, %arg8: memref<1x128xf32, #tpu.memory_space<vmem>>, %arg9: memref<128x128xf32, #tpu.memory_space<vmem>>, %arg10: memref<1x128xf32, #tpu.memory_space<vmem>>, %arg11: memref<16x128xf32, #tpu.memory_space<vmem>>, %arg12: memref<1x128xf32, #tpu.memory_space<vmem>>, %arg13: memref<1x128xf32, #tpu.memory_space<vmem>>, %arg14: memref<1x5x128xf32, #tpu.memory_space<vmem>>) attributes {dimension_semantics = [#tpu.dimension_semantics<parallel>], iteration_bounds = array<i64: 2>, scalar_prefetch = 0 : i64, scratch_operands = 0 : i64, tpu.core_type = #tpu.core_type<tc>, window_params = [{transform_indices = @transform_0, window_bounds = array<i64: 1, 32, 256>}, {pipeline_mode = #tpu.pipeline_mode<synchronous>, transform_indices = @transform_1, window_bounds = array<i64: 16, 256>}, {pipeline_mode = #tpu.pipeline_mode<synchronous>, transform_indices = @transform_2, window_bounds = array<i64: 32, 128>}, {pipeline_mode = #tpu.pipeline_mode<synchronous>, transform_indices = @transform_3, window_bounds = array<i64: 1, 128>}, {pipeline_mode = #tpu.pipeline_mode<synchronous>, transform_indices = @transform_4, window_bounds = array<i64: 128, 128>}, {pipeline_mode = #tpu.pipeline_mode<synchronous>, transform_indices = @transform_5, window_bounds = array<i64: 1, 128>}, {pipeline_mode = #tpu.pipeline_mode<synchronous>, transform_indices = @transform_6, window_bounds = array<i64: 32, 128>}, {pipeline_mode = #tpu.pipeline_mode<synchronous>, transform_indices = @transform_7, window_bounds = array<i64: 1, 128>}, {pipeline_mode = #tpu.pipeline_mode<synchronous>, transform_indices = @transform_8, window_bounds = array<i64: 128, 128>}, {pipeline_mode = #tpu.pipeline_mode<synchronous>, transform_indices = @transform_9, window_bounds = array<i64: 1, 128>}, {pipeline_mode = #tpu.pipeline_mode<synchronous>, transform_indices = @transform_10, window_bounds = array<i64: 16, 128>}, {pipeline_mode = #tpu.pipeline_mode<synchronous>, transform_indices = @transform_11, window_bounds = array<i64: 1, 128>}, {pipeline_mode = #tpu.pipeline_mode<synchronous>, transform_indices = @transform_12, window_bounds = array<i64: 1, 128>}, {transform_indices = @transform_13, window_bounds = array<i64: 1, 5, 128>}]} {
    %c0 = arith.constant 0 : index
    %c0_0 = arith.constant 0 : index
    %0 = vector.load %arg2[%c0, %c0_0] : memref<16x256xf32, #tpu.memory_space<vmem>>, vector<16x256xf32>
    %1 = vector.shape_cast %0 : vector<16x256xf32> to vector<1x16x256xf32>
    %c0_1 = arith.constant 0 : index
    %c0_2 = arith.constant 0 : index
    %c0_3 = arith.constant 0 : index
    %2 = vector.load %arg1[%c0_1, %c0_2, %c0_3] : memref<1x32x256xf32, #tpu.memory_space<vmem>>, vector<1x32x256xf32>
    "tpu.trace_start"() <{level = 10 : i32, message = "bpx,bcx->bpc"}> : () -> ()
    %cst = arith.constant dense<0.000000e+00> : vector<1x16x32xf32>
    %3 = tpu.matmul %1, %2, %cst {dimension_numbers = #tpu.dot_dimension_numbers<[2], [2], [1], [1], [0, 0, 0, 1, 1, 1], [0], [0]>} : vector<1x16x256xf32>, vector<1x32x256xf32>, vector<1x16x32xf32> -> vector<1x16x32xf32>
    "tpu.trace_stop"() : () -> ()
    %4 = vector.extract_strided_slice %3 {offsets = [0, 0, 0], sizes = [1, 8, 32], strides = [1, 1, 1]} : vector<1x16x32xf32> to vector<1x8x32xf32>
    %5 = vector.shape_cast %4 : vector<1x8x32xf32> to vector<8x32xf32>
    %6 = vector.extract_strided_slice %3 {offsets = [0, 8, 0], sizes = [1, 8, 32], strides = [1, 1, 1]} : vector<1x16x32xf32> to vector<1x8x32xf32>
    %7 = vector.shape_cast %6 : vector<1x8x32xf32> to vector<8x32xf32>
    %c0_4 = arith.constant 0 : index
    %c0_5 = arith.constant 0 : index
    %8 = vector.load %arg3[%c0_4, %c0_5] : memref<32x128xf32, #tpu.memory_space<vmem>>, vector<32x128xf32>
    %cst_6 = arith.constant dense<0.000000e+00> : vector<8x128xf32>
    %9 = tpu.matmul %5, %8, %cst_6 {dimension_numbers = #tpu.dot_dimension_numbers<[1], [0], [0], [1], [0, 0, 1, 1], [], []>} : vector<8x32xf32>, vector<32x128xf32>, vector<8x128xf32> -> vector<8x128xf32>
    %c0_7 = arith.constant 0 : index
    %c0_8 = arith.constant 0 : index
    %10 = vector.load %arg4[%c0_7, %c0_8] : memref<1x128xf32, #tpu.memory_space<vmem>>, vector<1x128xf32>
    %11 = vector.broadcast %10 : vector<1x128xf32> to vector<8x128xf32>
    %12 = arith.addf %9, %11 : vector<8x128xf32>
    %cst_9 = arith.constant 0.000000e+00 : f32
    %13 = vector.broadcast %cst_9 : f32 to vector<8x128xf32>
    %14 = arith.maximumf %12, %13 : vector<8x128xf32>
    %c0_10 = arith.constant 0 : index
    %c0_11 = arith.constant 0 : index
    %15 = vector.load %arg5[%c0_10, %c0_11] : memref<128x128xf32, #tpu.memory_space<vmem>>, vector<128x128xf32>
    %cst_12 = arith.constant dense<0.000000e+00> : vector<8x128xf32>
    %16 = tpu.matmul %14, %15, %cst_12 {dimension_numbers = #tpu.dot_dimension_numbers<[1], [0], [0], [1], [0, 0, 1, 1], [], []>} : vector<8x128xf32>, vector<128x128xf32>, vector<8x128xf32> -> vector<8x128xf32>
    %c0_13 = arith.constant 0 : index
    %c0_14 = arith.constant 0 : index
    %17 = vector.load %arg6[%c0_13, %c0_14] : memref<1x128xf32, #tpu.memory_space<vmem>>, vector<1x128xf32>
    %18 = vector.broadcast %17 : vector<1x128xf32> to vector<8x128xf32>
    %19 = arith.addf %16, %18 : vector<8x128xf32>
    %20 = vector.shape_cast %19 : vector<8x128xf32> to vector<1x8x128xf32>
    %c0_15 = arith.constant 0 : index
    %c0_16 = arith.constant 0 : index
    %21 = vector.load %arg7[%c0_15, %c0_16] : memref<32x128xf32, #tpu.memory_space<vmem>>, vector<32x128xf32>
    %cst_17 = arith.constant dense<0.000000e+00> : vector<8x128xf32>
    %22 = tpu.matmul %7, %21, %cst_17 {dimension_numbers = #tpu.dot_dimension_numbers<[1], [0], [0], [1], [0, 0, 1, 1], [], []>} : vector<8x32xf32>, vector<32x128xf32>, vector<8x128xf32> -> vector<8x128xf32>
    %c0_18 = arith.constant 0 : index
    %c0_19 = arith.constant 0 : index
    %23 = vector.load %arg8[%c0_18, %c0_19] : memref<1x128xf32, #tpu.memory_space<vmem>>, vector<1x128xf32>
    %24 = vector.broadcast %23 : vector<1x128xf32> to vector<8x128xf32>
    %25 = arith.addf %22, %24 : vector<8x128xf32>
    %cst_20 = arith.constant 0.000000e+00 : f32
    %26 = vector.broadcast %cst_20 : f32 to vector<8x128xf32>
    %27 = arith.maximumf %25, %26 : vector<8x128xf32>
    %c0_21 = arith.constant 0 : index
    %c0_22 = arith.constant 0 : index
    %28 = vector.load %arg9[%c0_21, %c0_22] : memref<128x128xf32, #tpu.memory_space<vmem>>, vector<128x128xf32>
    %cst_23 = arith.constant dense<0.000000e+00> : vector<8x128xf32>
    %29 = tpu.matmul %27, %28, %cst_23 {dimension_numbers = #tpu.dot_dimension_numbers<[1], [0], [0], [1], [0, 0, 1, 1], [], []>} : vector<8x128xf32>, vector<128x128xf32>, vector<8x128xf32> -> vector<8x128xf32>
    %c0_24 = arith.constant 0 : index
    %c0_25 = arith.constant 0 : index
    %30 = vector.load %arg10[%c0_24, %c0_25] : memref<1x128xf32, #tpu.memory_space<vmem>>, vector<1x128xf32>
    %31 = vector.broadcast %30 : vector<1x128xf32> to vector<8x128xf32>
    %32 = arith.addf %29, %31 : vector<8x128xf32>
    %33 = vector.shape_cast %32 : vector<8x128xf32> to vector<1x8x128xf32>
    %c0_26 = arith.constant 0 : index
    %c0_27 = arith.constant 0 : index
    %34 = vector.load %arg11[%c0_26, %c0_27] : memref<16x128xf32, #tpu.memory_space<vmem>>, vector<16x128xf32>
    %c0_28 = arith.constant 0 : index
    %c0_29 = arith.constant 0 : index
    %35 = vector.load %arg12[%c0_28, %c0_29] : memref<1x128xf32, #tpu.memory_space<vmem>>, vector<1x128xf32>
    %c0_30 = arith.constant 0 : index
    %c0_31 = arith.constant 0 : index
    %36 = vector.load %arg13[%c0_30, %c0_31] : memref<1x128xf32, #tpu.memory_space<vmem>>, vector<1x128xf32>
    %37 = vector.extract_strided_slice %34 {offsets = [0, 0], sizes = [8, 128], strides = [1, 1]} : vector<16x128xf32> to vector<8x128xf32>
    %38 = vector.shape_cast %37 : vector<8x128xf32> to vector<1x8x128xf32>
    %39 = arith.addf %20, %38 : vector<1x8x128xf32>
    %cst_32 = arith.constant dense<0.000000e+00> : vector<1x8xf32>
    %40 = vector.multi_reduction <add>, %39, %cst_32 [2] : vector<1x8x128xf32> to vector<1x8xf32>
    %41 = vector.shape_cast %40 : vector<1x8xf32> to vector<1x8x1xf32>
    %cst_33 = arith.constant 1.280000e+02 : f32
    %42 = vector.broadcast %cst_33 : f32 to vector<1x8x1xf32>
    %43 = arith.divf %41, %42 : vector<1x8x1xf32>
    %44 = vector.broadcast %43 : vector<1x8x1xf32> to vector<1x8x128xf32>
    %45 = arith.subf %39, %44 : vector<1x8x128xf32>
    %46 = arith.mulf %45, %45 : vector<1x8x128xf32>
    %cst_34 = arith.constant dense<0.000000e+00> : vector<1x8xf32>
    %47 = vector.multi_reduction <add>, %46, %cst_34 [2] : vector<1x8x128xf32> to vector<1x8xf32>
    %48 = vector.shape_cast %47 : vector<1x8xf32> to vector<1x8x1xf32>
    %cst_35 = arith.constant 1.280000e+02 : f32
    %49 = vector.broadcast %cst_35 : f32 to vector<1x8x1xf32>
    %50 = arith.divf %48, %49 : vector<1x8x1xf32>
    %cst_36 = arith.constant 9.99999974E-6 : f32
    %51 = vector.broadcast %cst_36 : f32 to vector<1x8x1xf32>
    %52 = arith.addf %50, %51 : vector<1x8x1xf32>
    %53 = math.rsqrt %52 : vector<1x8x1xf32>
    %54 = vector.broadcast %53 : vector<1x8x1xf32> to vector<1x8x128xf32>
    %55 = arith.mulf %45, %54 : vector<1x8x128xf32>
    %56 = vector.shape_cast %35 : vector<1x128xf32> to vector<1x1x128xf32>
    %57 = vector.broadcast %56 : vector<1x1x128xf32> to vector<1x8x128xf32>
    %58 = arith.mulf %55, %57 : vector<1x8x128xf32>
    %59 = vector.shape_cast %36 : vector<1x128xf32> to vector<1x1x128xf32>
    %60 = vector.broadcast %59 : vector<1x1x128xf32> to vector<1x8x128xf32>
    %61 = arith.addf %58, %60 : vector<1x8x128xf32>
    %62 = vector.extract_strided_slice %34 {offsets = [8, 0], sizes = [8, 128], strides = [1, 1]} : vector<16x128xf32> to vector<8x128xf32>
    %63 = vector.shape_cast %62 : vector<8x128xf32> to vector<1x8x128xf32>
    %64 = arith.addf %33, %63 : vector<1x8x128xf32>
    %cst_37 = arith.constant dense<0.000000e+00> : vector<1x8xf32>
    %65 = vector.multi_reduction <add>, %64, %cst_37 [2] : vector<1x8x128xf32> to vector<1x8xf32>
    %66 = vector.shape_cast %65 : vector<1x8xf32> to vector<1x8x1xf32>
    %cst_38 = arith.constant 1.280000e+02 : f32
    %67 = vector.broadcast %cst_38 : f32 to vector<1x8x1xf32>
    %68 = arith.divf %66, %67 : vector<1x8x1xf32>
    %69 = vector.broadcast %68 : vector<1x8x1xf32> to vector<1x8x128xf32>
    %70 = arith.subf %64, %69 : vector<1x8x128xf32>
    %71 = arith.mulf %70, %70 : vector<1x8x128xf32>
    %cst_39 = arith.constant dense<0.000000e+00> : vector<1x8xf32>
    %72 = vector.multi_reduction <add>, %71, %cst_39 [2] : vector<1x8x128xf32> to vector<1x8xf32>
    %73 = vector.shape_cast %72 : vector<1x8xf32> to vector<1x8x1xf32>
    %cst_40 = arith.constant 1.280000e+02 : f32
    %74 = vector.broadcast %cst_40 : f32 to vector<1x8x1xf32>
    %75 = arith.divf %73, %74 : vector<1x8x1xf32>
    %cst_41 = arith.constant 9.99999974E-6 : f32
    %76 = vector.broadcast %cst_41 : f32 to vector<1x8x1xf32>
    %77 = arith.addf %75, %76 : vector<1x8x1xf32>
    %78 = math.rsqrt %77 : vector<1x8x1xf32>
    %79 = vector.broadcast %78 : vector<1x8x1xf32> to vector<1x8x128xf32>
    %80 = arith.mulf %70, %79 : vector<1x8x128xf32>
    %81 = vector.shape_cast %35 : vector<1x128xf32> to vector<1x1x128xf32>
    %82 = vector.broadcast %81 : vector<1x1x128xf32> to vector<1x8x128xf32>
    %83 = arith.mulf %80, %82 : vector<1x8x128xf32>
    %84 = vector.shape_cast %36 : vector<1x128xf32> to vector<1x1x128xf32>
    %85 = vector.broadcast %84 : vector<1x1x128xf32> to vector<1x8x128xf32>
    %86 = arith.addf %83, %85 : vector<1x8x128xf32>
    %87 = vector.extract_strided_slice %61 {offsets = [0, 0, 0], sizes = [1, 1, 128], strides = [1, 1, 1]} : vector<1x8x128xf32> to vector<1x1x128xf32>
    %c0_42 = arith.constant 0 : index
    %c0_43 = arith.constant 0 : index
    %c0_44 = arith.constant 0 : index
    %88 = vector.load %arg14[%c0_42, %c0_43, %c0_44] : memref<1x5x128xf32, #tpu.memory_space<vmem>>, vector<1x1x128xf32>
    tpu.vector_store %arg14[%c0_42, %c0_43, %c0_44], %87 {strides = array<i32>} : memref<1x5x128xf32, #tpu.memory_space<vmem>>, vector<1x1x128xf32>,
    %89 = vector.extract_strided_slice %86 {offsets = [0, 0, 0], sizes = [1, 4, 128], strides = [1, 1, 1]} : vector<1x8x128xf32> to vector<1x4x128xf32>
    %c0_45 = arith.constant 0 : index
    %c1 = arith.constant 1 : index
    %c0_46 = arith.constant 0 : index
    %90 = vector.load %arg14[%c0_45, %c1, %c0_46] : memref<1x5x128xf32, #tpu.memory_space<vmem>>, vector<1x4x128xf32>
    tpu.vector_store %arg14[%c0_45, %c1, %c0_46], %89 {strides = array<i32>} : memref<1x5x128xf32, #tpu.memory_space<vmem>>, vector<1x4x128xf32>,
    return
  }
  func.func @transform_0(%arg0: i32) -> (i32, i32, i32) {
    %c0_i32 = arith.constant 0 : i32
    %c0_i32_0 = arith.constant 0 : i32
    %c0_i32_1 = arith.constant 0 : i32
    return %arg0, %c0_i32, %c0_i32_0 : i32, i32, i32
  }
  func.func @transform_1(%arg0: i32) -> (i32, i32) {
    %c0_i32 = arith.constant 0 : i32
    %c0_i32_0 = arith.constant 0 : i32
    %c0_i32_1 = arith.constant 0 : i32
    return %c0_i32, %c0_i32_0 : i32, i32
  }
  func.func @transform_2(%arg0: i32) -> (i32, i32) {
    %c0_i32 = arith.constant 0 : i32
    %c0_i32_0 = arith.constant 0 : i32
    %c0_i32_1 = arith.constant 0 : i32
    return %c0_i32, %c0_i32_0 : i32, i32
  }
  func.func @transform_3(%arg0: i32) -> (i32, i32) {
    %c0_i32 = arith.constant 0 : i32
    %c0_i32_0 = arith.constant 0 : i32
    %c0_i32_1 = arith.constant 0 : i32
    return %c0_i32, %c0_i32_0 : i32, i32
  }
  func.func @transform_4(%arg0: i32) -> (i32, i32) {
    %c0_i32 = arith.constant 0 : i32
    %c0_i32_0 = arith.constant 0 : i32
    %c0_i32_1 = arith.constant 0 : i32
    return %c0_i32, %c0_i32_0 : i32, i32
  }
  func.func @transform_5(%arg0: i32) -> (i32, i32) {
    %c0_i32 = arith.constant 0 : i32
    %c0_i32_0 = arith.constant 0 : i32
    %c0_i32_1 = arith.constant 0 : i32
    return %c0_i32, %c0_i32_0 : i32, i32
  }
  func.func @transform_6(%arg0: i32) -> (i32, i32) {
    %c0_i32 = arith.constant 0 : i32
    %c0_i32_0 = arith.constant 0 : i32
    %c0_i32_1 = arith.constant 0 : i32
    return %c0_i32, %c0_i32_0 : i32, i32
  }
  func.func @transform_7(%arg0: i32) -> (i32, i32) {
    %c0_i32 = arith.constant 0 : i32
    %c0_i32_0 = arith.constant 0 : i32
    %c0_i32_1 = arith.constant 0 : i32
    return %c0_i32, %c0_i32_0 : i32, i32
  }
  func.func @transform_8(%arg0: i32) -> (i32, i32) {
    %c0_i32 = arith.constant 0 : i32
    %c0_i32_0 = arith.constant 0 : i32
    %c0_i32_1 = arith.constant 0 : i32
    return %c0_i32, %c0_i32_0 : i32, i32
  }
  func.func @transform_9(%arg0: i32) -> (i32, i32) {
    %c0_i32 = arith.constant 0 : i32
    %c0_i32_0 = arith.constant 0 : i32
    %c0_i32_1 = arith.constant 0 : i32
    return %c0_i32, %c0_i32_0 : i32, i32
  }
  func.func @transform_10(%arg0: i32) -> (i32, i32) {
    %c0_i32 = arith.constant 0 : i32
    %c0_i32_0 = arith.constant 0 : i32
    %c0_i32_1 = arith.constant 0 : i32
    return %c0_i32, %c0_i32_0 : i32, i32
  }
  func.func @transform_11(%arg0: i32) -> (i32, i32) {
    %c0_i32 = arith.constant 0 : i32
    %c0_i32_0 = arith.constant 0 : i32
    %c0_i32_1 = arith.constant 0 : i32
    return %c0_i32, %c0_i32_0 : i32, i32
  }
  func.func @transform_12(%arg0: i32) -> (i32, i32) {
    %c0_i32 = arith.constant 0 : i32
    %c0_i32_0 = arith.constant 0 : i32
    %c0_i32_1 = arith.constant 0 : i32
    return %c0_i32, %c0_i32_0 : i32, i32
  }
  func.func @transform_13(%arg0: i32) -> (i32, i32, i32) {
    %c0_i32 = arith.constant 0 : i32
    %c0_i32_0 = arith.constant 0 : i32
    %c0_i32_1 = arith.constant 0 : i32
    return %arg0, %c0_i32, %c0_i32_0 : i32, i32, i32
  }
}

</mosaic_0001>

<bundles_post_ra>
// kernel: tpu_custom_call.1
= control target key start
LH: loop header
LB: loop body
LE: loop exit
PB: predicated region body
PF: predicated region fallthrough
CT: control target
= control target key end

     0   :  { %s1601_s0 = inlined_call_operand.hbm [shape: f32[2,32,256], index: 0, kind: input, shape index: {}]   ;;  %s1602_s1 = inlined_call_operand.hbm [shape: f32[16,256], index: 1, kind: input, shape index: {}]   ;;  %s1603_s2 = inlined_call_operand.hbm [shape: f32[32,128], index: 2, kind: input, shape index: {}]   ;;  %s1604_s3 = inlined_call_operand.vmem [shape: f32[1,128], index: 3, kind: input, shape index: {}]   ;;  %s1605_s4 = inlined_call_operand.hbm [shape: f32[128,128], index: 4, kind: input, shape index: {}]   ;;  %s1606_s5 = inlined_call_operand.vmem [shape: f32[1,128], index: 5, kind: input, shape index: {}]   ;;  %s1607_s6 = inlined_call_operand.hbm [shape: f32[32,128], index: 6, kind: input, shape index: {}]   ;;  %s1608_s7 = inlined_call_operand.vmem [shape: f32[1,128], index: 7, kind: input, shape index: {}]   ;;  %s1609_s8 = inlined_call_operand.hbm [shape: f32[128,128], index: 8, kind: input, shape index: {}]   ;;  %s1610_s9 = inlined_call_operand.vmem [shape: f32[1,128], index: 9, kind: input, shape index: {}]   ;;  %s1611_s10 = inlined_call_operand.hbm [shape: f32[16,128], index: 10, kind: input, shape index: {}]   ;;  %s1612_s11 = inlined_call_operand.vmem [shape: f32[1,128], index: 11, kind: input, shape index: {}]   ;;  %s1613_s12 = inlined_call_operand.vmem [shape: f32[1,128], index: 12, kind: input, shape index: {}]   ;;  %s1614_s13 = inlined_call_operand.vmem [shape: f32[2,5,128], index: 13, kind: output, shape index: {}]  }
   0x1   :  { %1615 = sst [smem:[#allocation17_spill]] %s1602_s1 }
   0x2   :  { %1616 = sst [smem:[#allocation18_spill]] %s1605_s4 }
   0x3   :  { %1617 = sst [smem:[#allocation19_spill]] %s1610_s9 }
   0x4   :  { %1618 = sst [smem:[#allocation20_spill]] %s1612_s11 }
   0x5   :  { %1619 = sst [smem:[#allocation21_spill]] %s1613_s12 }
   0x6   :  { %1620 = sst [smem:[#allocation22_spill]] %s1614_s13 }
   0x7   :  { %18 = vsyncpa [#allocation3], 0 }
   0x8   :  { %20 = vsyncpa [#allocation3 + $0x1], 0 }
   0x9   :  { %21 = vsyncpa [#allocation5], 0 }
   0xa   :  { %22 = vsyncpa [#allocation8], 0 }
   0xb   :  { %23 = vsyncpa [#allocation11], 0  ;;  %s1432_s25 = smov 0   ;;  %s1434_s26 = smov 0  }
   0xc   :  { %s1436_s27 = smov 0   ;;  %s1438_s28 = smov 0  }
   0xd LB: > { %s1621_s1 = sld [smem:[#allocation17_spill]]  ;;  %s1456_s15 = sadd.s32 4294967295, %s1349_s28   ;;  %s1349_s28 = sphi %s1438_s28, %s1634_s28   ;;  %s1345_s27 = sphi %s1436_s27, %s1633_s27   ;;  %s1341_s26 = sphi %s1434_s26, %s1632_s26   ;;  %s1337_s25 = sphi %s1432_s25, %s1631_s25  }
   0xe   : > { %p951_p0 = scmp.ge.s32.totalorder %s1349_s28, 1  ;;  %p50_p1 = scmp.eq.s32.totalorder %s1456_s15, 0 }
   0xf   : > { %p338_p2 = scmp.lt.s32.totalorder %s1349_s28, 3  ;;  %s1351_s17 = smov [#allocation4]  }
  0x10   : > { %s351_s18 = sshll.u32 %s1351_s17, 4  ;;  %s1624_s4 = sld [smem:[#allocation18_spill]]  ;;  %s352_s18 = int_to_ptr.vmem [resolvable:$true] %s351_s18 }
  0x11   : > { %p1461_p3 = pnand %p951_p0, %p338_p2  ;;  %s1352_s23 = smov 256  }
  0x12   : > { %s1353_s24 = smov 16   ;;  %s1354_s29 = smov [#allocation7]  }
  0x13   : > { %s349_s14 = sshll.u32 %s1621_s1, 4  ;;  %p1002_p4 = pneg %p1461_p3  ;;  %s350_s14 = int_to_ptr.hbm [resolvable:$true] %s349_s14 }
  0x14   : > { %s382_s30 = sshll.u32 %s1354_s29, 4  ;;  %s414_s13 = sshll.u32 %s1609_s8, 4  ;;  %s383_s30 = int_to_ptr.vmem [resolvable:$true] %s382_s30  ;;  %s415_s13 = int_to_ptr.hbm [resolvable:$true] %s414_s13 }
  0x15   : > { %p1469_p5 = pnand %p1002_p4, %p50_p1  ;;  %s1355_s20 = smov 128  }
  0x16   : > { %s380_s22 = sshll.u32 %s1624_s4, 4  ;;  %s1356_s21 = smov 8   ;;  %s381_s22 = int_to_ptr.hbm [resolvable:$true] %s380_s22 }
  0x17   : > { %1005 = dma.hbm_to_vmem [thread:$0]  (!%p1469_p5), %s350_s14, 512, %s352_s18, [#allocation5], %s1352_s23, %s1352_s23, %s1353_s24  }
  0x18   : > { %1011 = dma.hbm_to_vmem [thread:$0]  (!%p1469_p5), %s381_s22, 2048, %s383_s30, [#allocation8], %s1355_s20, %s1355_s20, %s1356_s21  }
  0x19   : > { %s363_s11 = sshll.u32 %s1603_s2, 4  ;;  %s1357_s9 = smov [#allocation10]   ;;  %s364_s11 = int_to_ptr.hbm [resolvable:$true] %s363_s11 }
  0x1a   : > { %s416_s14 = sshll.u32 %s1357_s9, 4  ;;  %s1358_s1 = smov [#allocation6]   ;;  %s417_s14 = int_to_ptr.vmem [resolvable:$true] %s416_s14 }
  0x1b   : > { %1017 = dma.hbm_to_vmem [thread:$0]  (!%p1469_p5), %s415_s13, 2048, %s417_s14, [#allocation11], %s1355_s20, %s1355_s20, %s1356_s21  }
  0x1c   : > { %s365_s18 = sshll.u32 %s1358_s1, 4  ;;  %s397_s22 = sshll.u32 %s1607_s6, 4  ;;  %s366_s18 = int_to_ptr.vmem [resolvable:$true] %s365_s18  ;;  %s398_s22 = int_to_ptr.hbm [resolvable:$true] %s397_s22 }
  0x1d   : > { %1008 = dma.hbm_to_vmem [thread:$0]  (!%p1469_p5), %s364_s11, 512, %s366_s18, [#allocation5], %s1355_s20, %s1355_s20, %s1356_s21  }
  0x1e   : > { %s431_s12 = sshll.u32 %s1611_s10, 4  ;;  %s1359_s13 = smov [#allocation9]   ;;  %s432_s12 = int_to_ptr.hbm [resolvable:$true] %s431_s12 }
  0x1f   : > { %s399_s30 = sshll.u32 %s1359_s13, 4  ;;  %s1360_s14 = smov [#allocation12]   ;;  %s400_s30 = int_to_ptr.vmem [resolvable:$true] %s399_s30 }
  0x20   : > { %1014 = dma.hbm_to_vmem [thread:$0]  (!%p1469_p5), %s398_s22, 512, %s400_s30, [#allocation8], %s1355_s20, %s1355_s20, %s1356_s21  }
  0x21   : > { %s433_s11 = sshll.u32 %s1360_s14, 4  ;;  %s1504_s1 = sadd.s32 1, %s1349_s28   ;;  %s434_s11 = int_to_ptr.vmem [resolvable:$true] %s433_s11 }
  0x22   : > { %1020 = dma.hbm_to_vmem [thread:$0]  (!%p1469_p5), %s432_s12, 256, %s434_s11, [#allocation11], %s1355_s20, %s1355_s20, %s1356_s21  }
  0x23   : > { %s33_s18 = ssub.s32 %s1349_s28, %s1504_s1  ;;  %s36_s29 = sadd.s32 1, %s1345_s27 }
  0x24   : > { %p34_p6 = scmp.eq.s32.totalorder %s33_s18, 0  ;;  %p43_p7 = scmp.ne.s32.totalorder %s1345_s27, %s1341_s26 }
  0x25   : > { %p44_p8 = scmp.eq.s32.totalorder %s1349_s28, 0  ;;  %p49_p9 = scmp.ne.s32.totalorder %s1341_s26, %s1337_s25 }
  0x26   : > { %s1515_s17 = scalar_select %p34_p6, %s1345_s27, %s36_s29  }
  0x27   : > { %p1519_p10 = por %p50_p1, %p49_p9  ;;  %p1031_p11 = scmp.lt.s32.totalorder %s1349_s28, 2 }
  0x28   : > { %s453_s4 = sand.u32 1, %s1345_s27   ;;  %s975_s19 = sshll.u32 %s1349_s28, 6 }
  0x29   : > { %p45_p12 = por %p44_p8, %p43_p7  ;;  %s959_s20 = sshll.u32 %s453_s4, 6 }
  0x2a   : > { %s462_s12 = scalar_lea.hbm %s1601_s0, %s975_s19  ;;  %s457_s30 = scalar_lea.vmem [#allocation2], %s959_s20 }
  0x2b   : > { %s463_s13 = sshll.u32 %s462_s12, 4  ;;  %s465_s14 = sshll.u32 %s457_s30, 4  ;;  %s464_s13 = int_to_ptr.hbm [resolvable:$true] %s463_s13  ;;  %s466_s14 = int_to_ptr.vmem [resolvable:$true] %s465_s14 }
  0x2c   : > { %p1529_p13 = pnand %p1031_p11, %p45_p12  ;;  %s454_s11 = scalar_lea.sflag [#allocation3], %s453_s4 }
  0x2d   : > { %s1273_s18 = sshra.s32 %s464_s13, 4  ;;  %s1280_s20 = scalar_lea.hbm %s1601_s0, 128  ;;  %s1274_s18 = int_to_ptr.hbm [resolvable:$true] %s1273_s18 }
  0x2e   : > { %s1275_s28 = scalar_lea.hbm %s1274_s18, 64  ;;  %p1277_p2 = pneg %p1529_p13 }
  0x2f   : > { %p1276_p0 = scmp.ne.s32.totalorder %s1274_s18, %s1275_s28  ;;  %p1281_p6 = scmp.lt.s32.totalorder %s1274_s18, %s1601_s0 }
  0x30   : > { %p1282_p7 = scmp.lt.s32.totalorder %s1280_s20, %s1275_s28 }
  0x31   : > { %p1278_p4 = pnand %p1277_p2, %p1276_p0 }
  0x32   : > { %p1283_p8 = por %p1282_p7, %p1281_p6 }
  0x33   : > { %p1279_p5 = pneg %p1278_p4 }
  0x35   : > { %p1284_p9 = pnand %p1283_p8, %p1279_p5 }
  0x37   : > { %1287 = shalt.err (!%p1284_p9)
}
  0x38   : > { %1024 = dma.hbm_to_vmem [thread:$0]  (!%p1529_p13), %s464_s13, 1024, %s466_s14, %s454_s11, %s1352_s23, %s1352_s23, %s1353_s24  }
  0x39   : > { %477 = sbr.rel (%p1461_p3) target bundleno = 760 (0x2f8), region = 72  ;;  %s479_s4 = sand.u32 (!%p1461_p3), 1, %s1341_s26  }
  0x3a   : > { %s963_s12 = sshll.u32 (!%p1461_p3), %s479_s4, 6  ;;  %s480_s30 = scalar_lea.sflag (!%p1461_p3), [#allocation3], %s479_s4 }
  0x3b   : > { %s483_s29 = scalar_lea.vmem (!%p1461_p3), [#allocation2], %s963_s12 }
  0x3e   : > { %1320 = dma.done.wait (%p1519_p10), %s480_s30, 1024  }
  0x3f   : > { %1322 = vsyncadd (%p1519_p10), %s480_s30, 4294966272 }
  0x40   : > { %1324 = dma.done.wait (%p50_p1), [#allocation5], 1024  }
  0x41   : > { %1326 = vsyncadd (%p50_p1), [#allocation5], 4294966272 }
  0x42   : > { %1328 = dma.done.wait (%p50_p1), [#allocation8], 2560  }
  0x43   : > { %1330 = vsyncadd (%p50_p1), [#allocation8], 4294964736 }
  0x44   : > { %1332 = dma.done.wait (%p50_p1), [#allocation11], 2304  }
  0x45   : > { %1334 = vsyncadd (%p50_p1), [#allocation11], 4294964992  ;;  %v570_v0 = vld [vmem:[%s483_s29 + $0x30] sm:$0xff]  ;;  %v571_v1 = vld [vmem:[%s483_s29 + $0x38] sm:$0xff]  ;;  %vm626_vm0 = vcmask 261120   ;;  %s1627_s18 = sld [smem:[#allocation19_spill]] }
  0x46   : > { %584 = vmatpush.xpose.msra.mxu2 %v570_v0  ;;  %607 = vmatpush.xpose.msra.mxu1 %v571_v1  ;;  %v568_v2 = vld [vmem:[%s483_s29 + $0x20] sm:$0xff]  ;;  %v569_v3 = vld [vmem:[%s483_s29 + $0x28] sm:$0xff]  ;;  %v566_v4 = vld [vmem:[%s483_s29 + $0x10] sm:$0xff]  ;;  %p556_p1 = scmp.lt.s32.totalorder %s1456_s15, 1  ;;  %s1628_s20 = sld [smem:[#allocation20_spill]] }
  0x47   : > { %v567_v5 = vld [vmem:[%s483_s29 + $0x18] sm:$0xff]  ;;  %v564_v6 = vld [vmem:[%s483_s29] sm:$0xff]  ;;  %v565_v7 = vld [vmem:[%s483_s29 + $0x8] sm:$0xff]  ;;  %s1629_s12 = sld [smem:[#allocation21_spill]] }
  0x48   : > { %v621_v8 = vld [vmem:[#allocation6 + $0x18] sm:$0xff]  ;;  %v560_v10 = vld [vmem:[#allocation4] sm:$0xff]  ;;  %v561_v11 = vld [vmem:[#allocation4 + $0x8] sm:$0xff]  ;;  %s1636_s15 = smov (!%p556_p1, %s1456_s15), 1  ;;  %s1630_s16 = sld [smem:[#allocation22_spill]] }
  0x49   : > { %v694_v9 = vld [vmem:[#allocation9 + $0x18] sm:$0xff]  ;;  %v620_v12 = vld [vmem:[#allocation6 + $0x10] sm:$0xff]  ;;  %v619_v14 = vld [vmem:[#allocation6 + $0x8] sm:$0xff]  ;;  %s970_s21 = sshll.u32 %s1636_s15, 3 }
  0x4a   : > { %585 = vmatpush.xpose.msra.mxu2 %v568_v2  ;;  %608 = vmatpush.xpose.msra.mxu1 %v569_v3  ;;  %v693_v13 = vld [vmem:[#allocation9 + $0x10] sm:$0xff]  ;;  %v618_v15 = vld [vmem:[#allocation6] sm:$0xff]  ;;  %v563_v17 = vld [vmem:[#allocation4 + $0x18] sm:$0xff] }
  0x4b   : > { %v562_v16 = vld [vmem:[#allocation4 + $0x10] sm:$0xff]  ;;  %v692_v18 = vld [vmem:[#allocation9 + $0x8] sm:$0xff]  ;;  %v691_v19 = vld [vmem:[#allocation9] sm:$0xff] }
  0x4c   : > { %v666_v20 = vld [vmem:[#allocation7 + $0x78] sm:$0xff]  ;;  %v665_v21 = vld [vmem:[#allocation7 + $0x70] sm:$0xff]  ;;  %v664_v22 = vld [vmem:[#allocation7 + $0x68] sm:$0xff] }
  0x4d   : > { %671 = vmatpush.msra.mxu3 %v666_v20  ;;  %v738_v23 = vld [vmem:[#allocation10 + $0x78] sm:$0xff]  ;;  %v737_v24 = vld [vmem:[#allocation10 + $0x70] sm:$0xff]  ;;  %v663_v25 = vld [vmem:[#allocation7 + $0x60] sm:$0xff] }
  0x4e   : > { %586 = vmatpush.xpose.msra.mxu2 %v566_v4  ;;  %609 = vmatpush.xpose.msra.mxu1 %v567_v5  ;;  %v736_v26 = vld [vmem:[#allocation10 + $0x68] sm:$0xff]  ;;  %v662_v27 = vld [vmem:[#allocation7 + $0x58] sm:$0xff]  ;;  %v735_v28 = vld [vmem:[#allocation10 + $0x60] sm:$0xff]  ;;  %s559_s23 = scalar_lea.vmem %s1630_s16, %s970_s21 }
  0x4f   : > { %672 = vmatpush.msra.mxu3 %v665_v21  ;;  %743 = vmatpush.msra.mxu0 %v738_v23  ;;  %v661_v29 = vld [vmem:[#allocation7 + $0x50] sm:$0xff]  ;;  %v734_v30 = vld [vmem:[#allocation10 + $0x58] sm:$0xff]  ;;  %v660_v31 = vld [vmem:[#allocation7 + $0x48] sm:$0xff] }
  0x50   : > { %v733_v32 = vld [vmem:[#allocation10 + $0x50] sm:$0xff]  ;;  %v659_v33 = vld [vmem:[#allocation7 + $0x40] sm:$0xff]  ;;  %v658_v34 = vld [vmem:[#allocation7 + $0x38] sm:$0xff] }
  0x51   : > { %673 = vmatpush.msra.mxu3 %v664_v22  ;;  %744 = vmatpush.msra.mxu0 %v737_v24  ;;  %v657_v35 = vld [vmem:[#allocation7 + $0x30] sm:$0xff]  ;;  %v656_v37 = vld [vmem:[#allocation7 + $0x28] sm:$0xff]  ;;  %v655_v38 = vld [vmem:[#allocation7 + $0x20] sm:$0xff] }
  0x52   : > { %587 = vmatpush.xpose.msra.mxu2 %v564_v6  ;;  %610 = vmatpush.xpose.msra.mxu1 %v565_v7  ;;  %v654_v41 = vld [vmem:[#allocation7 + $0x18] sm:$0xff]  ;;  %v653_v45 = vld [vmem:[#allocation7 + $0x10] sm:$0xff]  ;;  %v732_v46 = vld [vmem:[#allocation10 + $0x48] sm:$0xff] }
  0x53   : > { %674 = vmatpush.msra.mxu3 %v663_v25  ;;  %745 = vmatpush.msra.mxu0 %v736_v26  ;;  %v652_v47 = vld [vmem:[#allocation7 + $0x8] sm:$0xff]  ;;  %v731_v48 = vld [vmem:[#allocation10 + $0x40] sm:$0xff]  ;;  %v730_v50 = vld [vmem:[#allocation10 + $0x38] sm:$0xff] }
  0x54   : > { %v651_v49 = vld [vmem:[#allocation7] sm:$0xff]  ;;  %v729_v51 = vld [vmem:[#allocation10 + $0x30] sm:$0xff]  ;;  %v728_v52 = vld [vmem:[#allocation10 + $0x28] sm:$0xff] }
  0x55   : > { %588 = vmatmul.f32.vlgmr.msra.gmra.mxu2 %v560_v10  ;;  %611 = vmatmul.f32.vlgmr.msra.gmra.mxu1 %v561_v11  ;;  %v727_v53 = vld [vmem:[#allocation10 + $0x20] sm:$0xff]  ;;  %v726_v54 = vld [vmem:[#allocation10 + $0x18] sm:$0xff]  ;;  %v725_v55 = vld [vmem:[#allocation10 + $0x10] sm:$0xff] }
  0x56   : > { %642 = vmatpush.msrb.mxu1 %v621_v8  ;;  %714 = vmatpush.msrb.mxu2 %v694_v9  ;;  %v724_v56 = vld [vmem:[#allocation10 + $0x8] sm:$0xff]  ;;  %v723_v57 = vld [vmem:[#allocation10] sm:$0xff] }
  0x57   : > { %675 = vmatpush.msra.mxu3 %v662_v27  ;;  %746 = vmatpush.msra.mxu0 %v735_v28  ;;  %v1081_v58 = vld [vmem:[%s1604_s3] ss:$0 sm:$0xff]  ;;  %v764_v9 = vld [vmem:[#allocation12 + $0x8] sm:$0xff] }
  0x58   : > { %643 = vmatpush.msrb.mxu1 %v620_v12  ;;  %715 = vmatpush.msrb.mxu2 %v693_v13  ;;  %v1082_v62 = vld [vmem:[%s1608_s7] ss:$0 sm:$0xff]  ;;  %v1361_v12 = vmov 128.0  }
  0x59   : > { %676 = vmatpush.msra.mxu3 %v661_v29  ;;  %747 = vmatpush.msra.mxu0 %v734_v30  ;;  %v1083_v2 = vld [vmem:[%s1606_s5] ss:$0 sm:$0xff]  ;;  %1087 = vrcp.f32 %v1361_v12 }
  0x5a   : > { %644 = vmatpush.msrb.mxu1 %v619_v14  ;;  %716 = vmatpush.msrb.mxu2 %v692_v18  ;;  %v763_v4 = vld [vmem:[#allocation12] sm:$0xff] }
  0x5b   : > { %677 = vmatpush.msra.mxu3 %v660_v31  ;;  %748 = vmatpush.msra.mxu0 %v733_v32  ;;  %v1084_v7 = vld [vmem:[%s1627_s18] ss:$0 sm:$0xff] }
  0x5c   : > { %645 = vmatpush.msrb.mxu1 %v618_v15  ;;  %717 = vmatpush.msrb.mxu2 %v691_v19 }
  0x5d   : > { %591 = vmatmul.f32.gmra.mxu2 %v562_v16  ;;  %614 = vmatmul.f32.gmra.mxu1 %v563_v17 }
  0x5e   : > { %678 = vmatpush.msra.mxu3 %v659_v33  ;;  %749 = vmatpush.msra.mxu0 %v732_v46 }
  0x5f   : > { %v1088_v13 = vpop.eup %1087 }
  0x60   : > { %679 = vmatpush.msra.mxu3 %v658_v34  ;;  %750 = vmatpush.msra.mxu0 %v731_v48  ;;  %v771_v14 = vmul.f32 128.0, %v1088_v13  ;;  %vm775_vm1 = vweird.f32 %v1088_v13 }
  0x62   : > { %680 = vmatpush.msra.mxu3 %v657_v35  ;;  %751 = vmatpush.msra.mxu0 %v730_v50  ;;  %v772_v15 = vsub.f32 1.0, %v771_v14 }
  0x64   : > { %681 = vmatpush.msra.mxu3 %v656_v37  ;;  %752 = vmatpush.msra.mxu0 %v729_v51  ;;  %v773_v16 = vmul.f32 %v1088_v13, %v772_v15 }
  0x66   : > { %682 = vmatpush.msra.mxu3 %v655_v38  ;;  %753 = vmatpush.msra.mxu0 %v728_v52  ;;  %v774_v17 = vadd.f32 %v1088_v13, %v773_v16 }
  0x68   : > { %683 = vmatpush.msra.mxu3 %v654_v41  ;;  %754 = vmatpush.msra.mxu0 %v727_v53  ;;  %v776_v18 = vsel %vm775_vm1, %v1088_v13, %v774_v17  ;;  %v1085_v41 = vld [vmem:[%s1628_s20] ss:$0 sm:$0xff] }
  0x6a   : > { %684 = vmatpush.msra.mxu3 %v653_v45  ;;  %755 = vmatpush.msra.mxu0 %v726_v54 }
  0x6c   : > { %685 = vmatpush.msra.mxu3 %v652_v47  ;;  %756 = vmatpush.msra.mxu0 %v725_v55 }
  0x6e   : > { %686 = vmatpush.msra.mxu3 %v651_v49  ;;  %757 = vmatpush.msra.mxu0 %v724_v56 }
  0x70   : > { %758 = vmatpush.msra.mxu0 %v723_v57 }
  0xd2   : > { %v612_v36 = vpop.f32.mrf.mxu1 }
  0xd8   : > { %v589_v39 = vpop.f32.mrf.mxu2 }
  0xd9   : > { %v613_v40 = vadd.f32 %v612_v36, %v589_v39 }
  0xda   : > { %v615_v42 = vpop.f32.mrf.mxu1 }
  0xdb   : > { %971 = vmatmul.msk.f32.vlgmr.msrb.gmra.mxu1 %vm626_vm0, %v613_v40 }
  0xe0   : > { %v592_v43 = vpop.f32.mrf.mxu2 }
  0xe1   : > { %v616_v44 = vadd.f32 %v615_v42, %v592_v43 }
  0xe3   : > { %972 = vmatmul.msk.f32.vlgmr.msrb.gmra.mxu2 %vm626_vm0, %v616_v44  ;;  %v1086_v44 = vld [vmem:[%s1629_s12] ss:$0 sm:$0xff] }
 0x158   : > { %v647_v59 = vpop.f32.mrf.mxu1 }
 0x159   : > { %v648_v60 = vadd.f32 %v1081_v58, %v647_v59 }
 0x15b   : > { %v650_v61 = vmax.f32 %v648_v60, 0.0 }
 0x15d   : > { %687 = vmatmul.f32.vlgmr.msra.gmra.mxu3 %v650_v61 }
 0x166   : > { %v719_v63 = vpop.f32.mrf.mxu2 }
 0x167   : > { %v720_v0 = vadd.f32 %v1082_v62, %v719_v63 }
 0x169   : > { %v722_v1 = vmax.f32 %v720_v0, 0.0 }
 0x16b   : > { %759 = vmatmul.f32.vlgmr.msra.gmra.mxu0 %v722_v1 }
 0x1e0   : > { %v688_v3 = vpop.f32.mrf.mxu3 }
 0x1e1   : > { %v689_v5 = vadd.f32 %v1083_v2, %v688_v3 }
 0x1e3   : > { %v767_v6 = vadd.f32 %v763_v4, %v689_v5 }
 0x1e5   : > { %768 = vadd.xlane.f32.xlu0 %v767_v6 }
 0x1e8   : > { %v760_v8 = vpop.f32.mrf.mxu0 }
 0x1e9   : > { %v761_v10 = vadd.f32 %v1084_v7, %v760_v8 }
 0x1eb   : > { %v803_v11 = vadd.f32 %v764_v9, %v761_v10 }
 0x1ed   : > { %804 = vadd.xlane.f32.xlu0 %v803_v11 }
 0x258   : > { %v769_v19 = vpop.xlane.xlu0 %768 }
 0x259   : > { %v777_v20 = vmul.f32 %v776_v18, %v769_v19 }
 0x25b   : > { %v778_v21 = vsub.f32 %v767_v6, %v777_v20 }
 0x25d   : > { %v779_v22 = vmul.f32 %v778_v21, %v778_v21 }
 0x25f   : > { %780 = vadd.xlane.f32.xlu1 %v779_v22 }
 0x260   : > { %v805_v23 = vpop.xlane.xlu0 %804 }
 0x261   : > { %v806_v24 = vmul.f32 %v805_v23, %v776_v18 }
 0x263   : > { %v807_v25 = vsub.f32 %v803_v11, %v806_v24 }
 0x265   : > { %v808_v26 = vmul.f32 %v807_v25, %v807_v25 }
 0x267   : > { %809 = vadd.xlane.f32.xlu1 %v808_v26 }
 0x2d2   : > { %v781_v27 = vpop.xlane.xlu1 %780 }
 0x2d3   : > { %v782_v28 = vmul.f32 %v781_v27, %v776_v18 }
 0x2d5   : > { %v783_v29 = vadd.f32 1e-05, %v782_v28 }
 0x2d7   : > { %1089 = vrsqrt.f32 %v783_v29  ;;  %vm790_vm3 = vweird.f32 %v783_v29 }
 0x2da   : > { %v810_v30 = vpop.xlane.xlu1 %809 }
 0x2db   : > { %v811_v31 = vmul.f32 %v810_v30, %v776_v18 }
 0x2dd   : > { %v1090_v32 = vpop.eup %1089  ;;  %v812_v33 = vadd.f32 1e-05, %v811_v31 }
 0x2de   : > { %v785_v34 = vmul.f32 %v1090_v32, %v783_v29  ;;  %vm791_vm2 = vweird.f32 %v1090_v32 }
 0x2df   : > { %1091 = vrsqrt.f32 %v812_v33  ;;  %vm792_vm4 = vmor %vm790_vm3, %vm791_vm2  ;;  %vm819_vm6 = vweird.f32 %v812_v33 }
 0x2e0   : > { %v786_v35 = vmul.f32 %v1090_v32, %v785_v34 }
 0x2e2   : > { %v787_v36 = vmul.f32 0.5, %v786_v35 }
 0x2e4   : > { %v788_v37 = vsub.f32 1.5, %v787_v36 }
 0x2e5   : > { %v1092_v38 = vpop.eup %1091 }
 0x2e6   : > { %v789_v39 = vmul.f32 %v1090_v32, %v788_v37  ;;  %v814_v40 = vmul.f32 %v1092_v38, %v812_v33  ;;  %vm820_vm5 = vweird.f32 %v1092_v38 }
 0x2e7   : > { %vm821_vm7 = vmor %vm819_vm6, %vm820_vm5 }
 0x2e8   : > { %v793_v42 = vsel %vm792_vm4, %v1090_v32, %v789_v39  ;;  %v815_v43 = vmul.f32 %v1092_v38, %v814_v40 }
 0x2e9   : > { %v794_v45 = vmul.f32 %v793_v42, %v778_v21 }
 0x2ea   : > { %v816_v46 = vmul.f32 0.5, %v815_v43 }
 0x2eb   : > { %v798_v47 = vmul.f32 %v1085_v41, %v794_v45 }
 0x2ec   : > { %v817_v48 = vsub.f32 1.5, %v816_v46 }
 0x2ed   : > { %v802_v49 = vadd.f32 %v1086_v44, %v798_v47 }
 0x2ee   : > { %v818_v50 = vmul.f32 %v1092_v38, %v817_v48 }
 0x2ef   : > { %826 = vst [vmem:[%s559_s23] sm:$0x1] %v802_v49 }
 0x2f0   : > { %v822_v51 = vsel %vm821_vm7, %v1092_v38, %v818_v50 }
 0x2f1   : > { %v823_v52 = vmul.f32 %v822_v51, %v807_v25 }
 0x2f3   : > { %v824_v53 = vmul.f32 %v1085_v41, %v823_v52 }
 0x2f5   : > { %v825_v54 = vadd.f32 %v1086_v44, %v824_v53 }
 0x2f7   : > { %827 = vst [vmem:[%s559_s23 + $0x1] sm:$0xf] %v825_v54 }
 0x2f8 PF: > { %p26_p3 = scmp.ge.s32.totalorder %s1504_s1, 4   ;;  %s1631_s25 = smov %s1341_s26 }
 0x2f9   : > { %s1632_s26 = smov %s1345_s27  ;;  %s1633_s27 = smov %s1515_s17 }
 0x2fa   : > { %s1634_s28 = smov %s1504_s1  ;;  %28 = sbr.rel (!%p26_p3) target bundleno = 13 (0xd), region = 136 }
 0x2ff   :  { %847 = vsyncpa [#allocation3], 1 }
 0x300   :  { %849 = vsyncpa [#allocation3 + $0x1], 1 }
 0x301   :  { %850 = vsyncpa [#allocation5], 1 }
 0x302   :  { %851 = vsyncpa [#allocation8], 1 }
 0x303   :  { %852 = vsyncpa [#allocation11], 1 }

// kernel: tpu_custom_call.1
= control target key start
LH: loop header
LB: loop body
LE: loop exit
PB: predicated region body
PF: predicated region fallthrough
CT: control target
= control target key end

     0   :  { %s1601_s0 = inlined_call_operand.hbm [shape: f32[2,32,256], index: 0, kind: input, shape index: {}]   ;;  %s1602_s1 = inlined_call_operand.hbm [shape: f32[16,256], index: 1, kind: input, shape index: {}]   ;;  %s1603_s2 = inlined_call_operand.hbm [shape: f32[32,128], index: 2, kind: input, shape index: {}]   ;;  %s1604_s3 = inlined_call_operand.vmem [shape: f32[1,128], index: 3, kind: input, shape index: {}]   ;;  %s1605_s4 = inlined_call_operand.hbm [shape: f32[128,128], index: 4, kind: input, shape index: {}]   ;;  %s1606_s5 = inlined_call_operand.vmem [shape: f32[1,128], index: 5, kind: input, shape index: {}]   ;;  %s1607_s6 = inlined_call_operand.hbm [shape: f32[32,128], index: 6, kind: input, shape index: {}]   ;;  %s1608_s7 = inlined_call_operand.vmem [shape: f32[1,128], index: 7, kind: input, shape index: {}]   ;;  %s1609_s8 = inlined_call_operand.hbm [shape: f32[128,128], index: 8, kind: input, shape index: {}]   ;;  %s1610_s9 = inlined_call_operand.vmem [shape: f32[1,128], index: 9, kind: input, shape index: {}]   ;;  %s1611_s10 = inlined_call_operand.hbm [shape: f32[16,128], index: 10, kind: input, shape index: {}]   ;;  %s1612_s11 = inlined_call_operand.vmem [shape: f32[1,128], index: 11, kind: input, shape index: {}]   ;;  %s1613_s12 = inlined_call_operand.vmem [shape: f32[1,128], index: 12, kind: input, shape index: {}]   ;;  %s1614_s13 = inlined_call_operand.vmem [shape: f32[2,5,128], index: 13, kind: output, shape index: {}]  }
   0x1   :  { %1615 = sst [smem:[#allocation17_spill]] %s1602_s1 }
   0x2   :  { %1616 = sst [smem:[#allocation18_spill]] %s1605_s4 }
   0x3   :  { %1617 = sst [smem:[#allocation19_spill]] %s1610_s9 }
   0x4   :  { %1618 = sst [smem:[#allocation20_spill]] %s1612_s11 }
   0x5   :  { %1619 = sst [smem:[#allocation21_spill]] %s1613_s12 }
   0x6   :  { %1620 = sst [smem:[#allocation22_spill]] %s1614_s13 }
   0x7   :  { %18 = vsyncpa [#allocation3], 0 }
   0x8   :  { %20 = vsyncpa [#allocation3 + $0x1], 0 }
   0x9   :  { %21 = vsyncpa [#allocation5], 0 }
   0xa   :  { %22 = vsyncpa [#allocation8], 0 }
   0xb   :  { %23 = vsyncpa [#allocation11], 0  ;;  %s1432_s25 = smov 0   ;;  %s1434_s26 = smov 0  }
   0xc   :  { %s1436_s27 = smov 0   ;;  %s1438_s28 = smov 0  }
   0xd LB: > { %s1621_s1 = sld [smem:[#allocation17_spill]]  ;;  %s1456_s15 = sadd.s32 4294967295, %s1349_s28   ;;  %s1349_s28 = sphi %s1438_s28, %s1634_s28   ;;  %s1345_s27 = sphi %s1436_s27, %s1633_s27   ;;  %s1341_s26 = sphi %s1434_s26, %s1632_s26   ;;  %s1337_s25 = sphi %s1432_s25, %s1631_s25  }
   0xe   : > { %p951_p0 = scmp.ge.s32.totalorder %s1349_s28, 1  ;;  %p50_p1 = scmp.eq.s32.totalorder %s1456_s15, 0 }
   0xf   : > { %p338_p2 = scmp.lt.s32.totalorder %s1349_s28, 3  ;;  %s1351_s17 = smov [#allocation4]  }
  0x10   : > { %s351_s18 = sshll.u32 %s1351_s17, 4  ;;  %s1624_s4 = sld [smem:[#allocation18_spill]]  ;;  %s352_s18 = int_to_ptr.vmem [resolvable:$true] %s351_s18 }
  0x11   : > { %p1461_p3 = pnand %p951_p0, %p338_p2  ;;  %s1352_s23 = smov 256  }
  0x12   : > { %s1353_s24 = smov 16   ;;  %s1354_s29 = smov [#allocation7]  }
  0x13   : > { %s349_s14 = sshll.u32 %s1621_s1, 4  ;;  %p1002_p4 = pneg %p1461_p3  ;;  %s350_s14 = int_to_ptr.hbm [resolvable:$true] %s349_s14 }
  0x14   : > { %s382_s30 = sshll.u32 %s1354_s29, 4  ;;  %s414_s13 = sshll.u32 %s1609_s8, 4  ;;  %s383_s30 = int_to_ptr.vmem [resolvable:$true] %s382_s30  ;;  %s415_s13 = int_to_ptr.hbm [resolvable:$true] %s414_s13 }
  0x15   : > { %p1469_p5 = pnand %p1002_p4, %p50_p1  ;;  %s1355_s20 = smov 128  }
  0x16   : > { %s380_s22 = sshll.u32 %s1624_s4, 4  ;;  %s1356_s21 = smov 8   ;;  %s381_s22 = int_to_ptr.hbm [resolvable:$true] %s380_s22 }
  0x17   : > { %1005 = dma.hbm_to_vmem [thread:$0]  (!%p1469_p5), %s350_s14, 512, %s352_s18, [#allocation5], %s1352_s23, %s1352_s23, %s1353_s24  }
  0x18   : > { %1011 = dma.hbm_to_vmem [thread:$0]  (!%p1469_p5), %s381_s22, 2048, %s383_s30, [#allocation8], %s1355_s20, %s1355_s20, %s1356_s21  }
  0x19   : > { %s363_s11 = sshll.u32 %s1603_s2, 4  ;;  %s1357_s9 = smov [#allocation10]   ;;  %s364_s11 = int_to_ptr.hbm [resolvable:$true] %s363_s11 }
  0x1a   : > { %s416_s14 = sshll.u32 %s1357_s9, 4  ;;  %s1358_s1 = smov [#allocation6]   ;;  %s417_s14 = int_to_ptr.vmem [resolvable:$true] %s416_s14 }
  0x1b   : > { %1017 = dma.hbm_to_vmem [thread:$0]  (!%p1469_p5), %s415_s13, 2048, %s417_s14, [#allocation11], %s1355_s20, %s1355_s20, %s1356_s21  }
  0x1c   : > { %s365_s18 = sshll.u32 %s1358_s1, 4  ;;  %s397_s22 = sshll.u32 %s1607_s6, 4  ;;  %s366_s18 = int_to_ptr.vmem [resolvable:$true] %s365_s18  ;;  %s398_s22 = int_to_ptr.hbm [resolvable:$true] %s397_s22 }
  0x1d   : > { %1008 = dma.hbm_to_vmem [thread:$0]  (!%p1469_p5), %s364_s11, 512, %s366_s18, [#allocation5], %s1355_s20, %s1355_s20, %s1356_s21  }
  0x1e   : > { %s431_s12 = sshll.u32 %s1611_s10, 4  ;;  %s1359_s13 = smov [#allocation9]   ;;  %s432_s12 = int_to_ptr.hbm [resolvable:$true] %s431_s12 }
  0x1f   : > { %s399_s30 = sshll.u32 %s1359_s13, 4  ;;  %s1360_s14 = smov [#allocation12]   ;;  %s400_s30 = int_to_ptr.vmem [resolvable:$true] %s399_s30 }
  0x20   : > { %1014 = dma.hbm_to_vmem [thread:$0]  (!%p1469_p5), %s398_s22, 512, %s400_s30, [#allocation8], %s1355_s20, %s1355_s20, %s1356_s21  }
  0x21   : > { %s433_s11 = sshll.u32 %s1360_s14, 4  ;;  %s1504_s1 = sadd.s32 1, %s1349_s28   ;;  %s434_s11 = int_to_ptr.vmem [resolvable:$true] %s433_s11 }
  0x22   : > { %1020 = dma.hbm_to_vmem [thread:$0]  (!%p1469_p5), %s432_s12, 256, %s434_s11, [#allocation11], %s1355_s20, %s1355_s20, %s1356_s21  }
  0x23   : > { %s33_s18 = ssub.s32 %s1349_s28, %s1504_s1  ;;  %s36_s29 = sadd.s32 1, %s1345_s27 }
  0x24   : > { %p34_p6 = scmp.eq.s32.totalorder %s33_s18, 0  ;;  %p43_p7 = scmp.ne.s32.totalorder %s1345_s27, %s1341_s26 }
  0x25   : > { %p44_p8 = scmp.eq.s32.totalorder %s1349_s28, 0  ;;  %p49_p9 = scmp.ne.s32.totalorder %s1341_s26, %s1337_s25 }
  0x26   : > { %s1515_s17 = scalar_select %p34_p6, %s1345_s27, %s36_s29  }
  0x27   : > { %p1519_p10 = por %p50_p1, %p49_p9  ;;  %p1031_p11 = scmp.lt.s32.totalorder %s1349_s28, 2 }
  0x28   : > { %s453_s4 = sand.u32 1, %s1345_s27   ;;  %s975_s19 = sshll.u32 %s1349_s28, 6 }
  0x29   : > { %p45_p12 = por %p44_p8, %p43_p7  ;;  %s959_s20 = sshll.u32 %s453_s4, 6 }
  0x2a   : > { %s462_s12 = scalar_lea.hbm %s1601_s0, %s975_s19  ;;  %s457_s30 = scalar_lea.vmem [#allocation2], %s959_s20 }
  0x2b   : > { %s463_s13 = sshll.u32 %s462_s12, 4  ;;  %s465_s14 = sshll.u32 %s457_s30, 4  ;;  %s464_s13 = int_to_ptr.hbm [resolvable:$true] %s463_s13  ;;  %s466_s14 = int_to_ptr.vmem [resolvable:$true] %s465_s14 }
  0x2c   : > { %p1529_p13 = pnand %p1031_p11, %p45_p12  ;;  %s454_s11 = scalar_lea.sflag [#allocation3], %s453_s4 }
  0x2d   : > { %s1273_s18 = sshra.s32 %s464_s13, 4  ;;  %s1280_s20 = scalar_lea.hbm %s1601_s0, 128  ;;  %s1274_s18 = int_to_ptr.hbm [resolvable:$true] %s1273_s18 }
  0x2e   : > { %s1275_s28 = scalar_lea.hbm %s1274_s18, 64  ;;  %p1277_p2 = pneg %p1529_p13 }
  0x2f   : > { %p1276_p0 = scmp.ne.s32.totalorder %s1274_s18, %s1275_s28  ;;  %p1281_p6 = scmp.lt.s32.totalorder %s1274_s18, %s1601_s0 }
  0x30   : > { %p1282_p7 = scmp.lt.s32.totalorder %s1280_s20, %s1275_s28 }
  0x31   : > { %p1278_p4 = pnand %p1277_p2, %p1276_p0 }
  0x32   : > { %p1283_p8 = por %p1282_p7, %p1281_p6 }
  0x33   : > { %p1279_p5 = pneg %p1278_p4 }
  0x35   : > { %p1284_p9 = pnand %p1283_p8, %p1279_p5 }
  0x37   : > { %1287 = shalt.err (!%p1284_p9)
}
  0x38   : > { %1024 = dma.hbm_to_vmem [thread:$0]  (!%p1529_p13), %s464_s13, 1024, %s466_s14, %s454_s11, %s1352_s23, %s1352_s23, %s1353_s24  }
  0x39   : > { %477 = sbr.rel (%p1461_p3) target bundleno = 760 (0x2f8), region = 72  ;;  %s479_s4 = sand.u32 (!%p1461_p3), 1, %s1341_s26  }
  0x3a   : > { %s963_s12 = sshll.u32 (!%p1461_p3), %s479_s4, 6  ;;  %s480_s30 = scalar_lea.sflag (!%p1461_p3), [#allocation3], %s479_s4 }
  0x3b   : > { %s483_s29 = scalar_lea.vmem (!%p1461_p3), [#allocation2], %s963_s12 }
  0x3e   : > { %1320 = dma.done.wait (%p1519_p10), %s480_s30, 1024  }
  0x3f   : > { %1322 = vsyncadd (%p1519_p10), %s480_s30, 4294966272 }
  0x40   : > { %1324 = dma.done.wait (%p50_p1), [#allocation5], 1024  }
  0x41   : > { %1326 = vsyncadd (%p50_p1), [#allocation5], 4294966272 }
  0x42   : > { %1328 = dma.done.wait (%p50_p1), [#allocation8], 2560  }
  0x43   : > { %1330 = vsyncadd (%p50_p1), [#allocation8], 4294964736 }
  0x44   : > { %1332 = dma.done.wait (%p50_p1), [#allocation11], 2304  }
  0x45   : > { %1334 = vsyncadd (%p50_p1), [#allocation11], 4294964992  ;;  %v570_v0 = vld [vmem:[%s483_s29 + $0x30] sm:$0xff]  ;;  %v571_v1 = vld [vmem:[%s483_s29 + $0x38] sm:$0xff]  ;;  %vm626_vm0 = vcmask 261120   ;;  %s1627_s18 = sld [smem:[#allocation19_spill]] }
  0x46   : > { %584 = vmatpush.xpose.msra.mxu2 %v570_v0  ;;  %607 = vmatpush.xpose.msra.mxu1 %v571_v1  ;;  %v568_v2 = vld [vmem:[%s483_s29 + $0x20] sm:$0xff]  ;;  %v569_v3 = vld [vmem:[%s483_s29 + $0x28] sm:$0xff]  ;;  %v566_v4 = vld [vmem:[%s483_s29 + $0x10] sm:$0xff]  ;;  %p556_p1 = scmp.lt.s32.totalorder %s1456_s15, 1  ;;  %s1628_s20 = sld [smem:[#allocation20_spill]] }
  0x47   : > { %v567_v5 = vld [vmem:[%s483_s29 + $0x18] sm:$0xff]  ;;  %v564_v6 = vld [vmem:[%s483_s29] sm:$0xff]  ;;  %v565_v7 = vld [vmem:[%s483_s29 + $0x8] sm:$0xff]  ;;  %s1629_s12 = sld [smem:[#allocation21_spill]] }
  0x48   : > { %v621_v8 = vld [vmem:[#allocation6 + $0x18] sm:$0xff]  ;;  %v560_v10 = vld [vmem:[#allocation4] sm:$0xff]  ;;  %v561_v11 = vld [vmem:[#allocation4 + $0x8] sm:$0xff]  ;;  %s1636_s15 = smov (!%p556_p1, %s1456_s15), 1  ;;  %s1630_s16 = sld [smem:[#allocation22_spill]] }
  0x49   : > { %v694_v9 = vld [vmem:[#allocation9 + $0x18] sm:$0xff]  ;;  %v620_v12 = vld [vmem:[#allocation6 + $0x10] sm:$0xff]  ;;  %v619_v14 = vld [vmem:[#allocation6 + $0x8] sm:$0xff]  ;;  %s970_s21 = sshll.u32 %s1636_s15, 3 }
  0x4a   : > { %585 = vmatpush.xpose.msra.mxu2 %v568_v2  ;;  %608 = vmatpush.xpose.msra.mxu1 %v569_v3  ;;  %v693_v13 = vld [vmem:[#allocation9 + $0x10] sm:$0xff]  ;;  %v618_v15 = vld [vmem:[#allocation6] sm:$0xff]  ;;  %v563_v17 = vld [vmem:[#allocation4 + $0x18] sm:$0xff] }
  0x4b   : > { %v562_v16 = vld [vmem:[#allocation4 + $0x10] sm:$0xff]  ;;  %v692_v18 = vld [vmem:[#allocation9 + $0x8] sm:$0xff]  ;;  %v691_v19 = vld [vmem:[#allocation9] sm:$0xff] }
  0x4c   : > { %v666_v20 = vld [vmem:[#allocation7 + $0x78] sm:$0xff]  ;;  %v665_v21 = vld [vmem:[#allocation7 + $0x70] sm:$0xff]  ;;  %v664_v22 = vld [vmem:[#allocation7 + $0x68] sm:$0xff] }
  0x4d   : > { %671 = vmatpush.msra.mxu3 %v666_v20  ;;  %v738_v23 = vld [vmem:[#allocation10 + $0x78] sm:$0xff]  ;;  %v737_v24 = vld [vmem:[#allocation10 + $0x70] sm:$0xff]  ;;  %v663_v25 = vld [vmem:[#allocation7 + $0x60] sm:$0xff] }
  0x4e   : > { %586 = vmatpush.xpose.msra.mxu2 %v566_v4  ;;  %609 = vmatpush.xpose.msra.mxu1 %v567_v5  ;;  %v736_v26 = vld [vmem:[#allocation10 + $0x68] sm:$0xff]  ;;  %v662_v27 = vld [vmem:[#allocation7 + $0x58] sm:$0xff]  ;;  %v735_v28 = vld [vmem:[#allocation10 + $0x60] sm:$0xff]  ;;  %s559_s23 = scalar_lea.vmem %s1630_s16, %s970_s21 }
  0x4f   : > { %672 = vmatpush.msra.mxu3 %v665_v21  ;;  %743 = vmatpush.msra.mxu0 %v738_v23  ;;  %v661_v29 = vld [vmem:[#allocation7 + $0x50] sm:$0xff]  ;;  %v734_v30 = vld [vmem:[#allocation10 + $0x58] sm:$0xff]  ;;  %v660_v31 = vld [vmem:[#allocation7 + $0x48] sm:$0xff] }
  0x50   : > { %v733_v32 = vld [vmem:[#allocation10 + $0x50] sm:$0xff]  ;;  %v659_v33 = vld [vmem:[#allocation7 + $0x40] sm:$0xff]  ;;  %v658_v34 = vld [vmem:[#allocation7 + $0x38] sm:$0xff] }
  0x51   : > { %673 = vmatpush.msra.mxu3 %v664_v22  ;;  %744 = vmatpush.msra.mxu0 %v737_v24  ;;  %v657_v35 = vld [vmem:[#allocation7 + $0x30] sm:$0xff]  ;;  %v656_v37 = vld [vmem:[#allocation7 + $0x28] sm:$0xff]  ;;  %v655_v38 = vld [vmem:[#allocation7 + $0x20] sm:$0xff] }
  0x52   : > { %587 = vmatpush.xpose.msra.mxu2 %v564_v6  ;;  %610 = vmatpush.xpose.msra.mxu1 %v565_v7  ;;  %v654_v41 = vld [vmem:[#allocation7 + $0x18] sm:$0xff]  ;;  %v653_v45 = vld [vmem:[#allocation7 + $0x10] sm:$0xff]  ;;  %v732_v46 = vld [vmem:[#allocation10 + $0x48] sm:$0xff] }
  0x53   : > { %674 = vmatpush.msra.mxu3 %v663_v25  ;;  %745 = vmatpush.msra.mxu0 %v736_v26  ;;  %v652_v47 = vld [vmem:[#allocation7 + $0x8] sm:$0xff]  ;;  %v731_v48 = vld [vmem:[#allocation10 + $0x40] sm:$0xff]  ;;  %v730_v50 = vld [vmem:[#allocation10 + $0x38] sm:$0xff] }
  0x54   : > { %v651_v49 = vld [vmem:[#allocation7] sm:$0xff]  ;;  %v729_v51 = vld [vmem:[#allocation10 + $0x30] sm:$0xff]  ;;  %v728_v52 = vld [vmem:[#allocation10 + $0x28] sm:$0xff] }
  0x55   : > { %588 = vmatmul.f32.vlgmr.msra.gmra.mxu2 %v560_v10  ;;  %611 = vmatmul.f32.vlgmr.msra.gmra.mxu1 %v561_v11  ;;  %v727_v53 = vld [vmem:[#allocation10 + $0x20] sm:$0xff]  ;;  %v726_v54 = vld [vmem:[#allocation10 + $0x18] sm:$0xff]  ;;  %v725_v55 = vld [vmem:[#allocation10 + $0x10] sm:$0xff] }
  0x56   : > { %642 = vmatpush.msrb.mxu1 %v621_v8  ;;  %714 = vmatpush.msrb.mxu2 %v694_v9  ;;  %v724_v56 = vld [vmem:[#allocation10 + $0x8] sm:$0xff]  ;;  %v723_v57 = vld [vmem:[#allocation10] sm:$0xff] }
  0x57   : > { %675 = vmatpush.msra.mxu3 %v662_v27  ;;  %746 = vmatpush.msra.mxu0 %v735_v28  ;;  %v1081_v58 = vld [vmem:[%s1604_s3] ss:$0 sm:$0xff]  ;;  %v764_v9 = vld [vmem:[#allocation12 + $0x8] sm:$0xff] }
  0x58   : > { %643 = vmatpush.msrb.mxu1 %v620_v12  ;;  %715 = vmatpush.msrb.mxu2 %v693_v13  ;;  %v1082_v62 = vld [vmem:[%s1608_s7] ss:$0 sm:$0xff]  ;;  %v1361_v12 = vmov 128.0  }
  0x59   : > { %676 = vmatpush.msra.mxu3 %v661_v29  ;;  %747 = vmatpush.msra.mxu0 %v734_v30  ;;  %v1083_v2 = vld [vmem:[%s1606_s5] ss:$0 sm:$0xff]  ;;  %1087 = vrcp.f32 %v1361_v12 }
  0x5a   : > { %644 = vmatpush.msrb.mxu1 %v619_v14  ;;  %716 = vmatpush.msrb.mxu2 %v692_v18  ;;  %v763_v4 = vld [vmem:[#allocation12] sm:$0xff] }
  0x5b   : > { %677 = vmatpush.msra.mxu3 %v660_v31  ;;  %748 = vmatpush.msra.mxu0 %v733_v32  ;;  %v1084_v7 = vld [vmem:[%s1627_s18] ss:$0 sm:$0xff] }
  0x5c   : > { %645 = vmatpush.msrb.mxu1 %v618_v15  ;;  %717 = vmatpush.msrb.mxu2 %v691_v19 }
  0x5d   : > { %591 = vmatmul.f32.gmra.mxu2 %v562_v16  ;;  %614 = vmatmul.f32.gmra.mxu1 %v563_v17 }
  0x5e   : > { %678 = vmatpush.msra.mxu3 %v659_v33  ;;  %749 = vmatpush.msra.mxu0 %v732_v46 }
  0x5f   : > { %v1088_v13 = vpop.eup %1087 }
  0x60   : > { %679 = vmatpush.msra.mxu3 %v658_v34  ;;  %750 = vmatpush.msra.mxu0 %v731_v48  ;;  %v771_v14 = vmul.f32 128.0, %v1088_v13  ;;  %vm775_vm1 = vweird.f32 %v1088_v13 }
  0x62   : > { %680 = vmatpush.msra.mxu3 %v657_v35  ;;  %751 = vmatpush.msra.mxu0 %v730_v50  ;;  %v772_v15 = vsub.f32 1.0, %v771_v14 }
  0x64   : > { %681 = vmatpush.msra.mxu3 %v656_v37  ;;  %752 = vmatpush.msra.mxu0 %v729_v51  ;;  %v773_v16 = vmul.f32 %v1088_v13, %v772_v15 }
  0x66   : > { %682 = vmatpush.msra.mxu3 %v655_v38  ;;  %753 = vmatpush.msra.mxu0 %v728_v52  ;;  %v774_v17 = vadd.f32 %v1088_v13, %v773_v16 }
  0x68   : > { %683 = vmatpush.msra.mxu3 %v654_v41  ;;  %754 = vmatpush.msra.mxu0 %v727_v53  ;;  %v776_v18 = vsel %vm775_vm1, %v1088_v13, %v774_v17  ;;  %v1085_v41 = vld [vmem:[%s1628_s20] ss:$0 sm:$0xff] }
  0x6a   : > { %684 = vmatpush.msra.mxu3 %v653_v45  ;;  %755 = vmatpush.msra.mxu0 %v726_v54 }
  0x6c   : > { %685 = vmatpush.msra.mxu3 %v652_v47  ;;  %756 = vmatpush.msra.mxu0 %v725_v55 }
  0x6e   : > { %686 = vmatpush.msra.mxu3 %v651_v49  ;;  %757 = vmatpush.msra.mxu0 %v724_v56 }
  0x70   : > { %758 = vmatpush.msra.mxu0 %v723_v57 }
  0xd2   : > { %v612_v36 = vpop.f32.mrf.mxu1 }
  0xd8   : > { %v589_v39 = vpop.f32.mrf.mxu2 }
  0xd9   : > { %v613_v40 = vadd.f32 %v612_v36, %v589_v39 }
  0xda   : > { %v615_v42 = vpop.f32.mrf.mxu1 }
  0xdb   : > { %971 = vmatmul.msk.f32.vlgmr.msrb.gmra.mxu1 %vm626_vm0, %v613_v40 }
  0xe0   : > { %v592_v43 = vpop.f32.mrf.mxu2 }
  0xe1   : > { %v616_v44 = vadd.f32 %v615_v42, %v592_v43 }
  0xe3   : > { %972 = vmatmul.msk.f32.vlgmr.msrb.gmra.mxu2 %vm626_vm0, %v616_v44  ;;  %v1086_v44 = vld [vmem:[%s1629_s12] ss:$0 sm:$0xff] }
 0x158   : > { %v647_v59 = vpop.f32.mrf.mxu1 }
 0x159   : > { %v648_v60 = vadd.f32 %v1081_v58, %v647_v59 }
 0x15b   : > { %v650_v61 = vmax.f32 %v648_v60, 0.0 }
 0x15d   : > { %687 = vmatmul.f32.vlgmr.msra.gmra.mxu3 %v650_v61 }
 0x166   : > { %v719_v63 = vpop.f32.mrf.mxu2 }
 0x167   : > { %v720_v0 = vadd.f32 %v1082_v62, %v719_v63 }
 0x169   : > { %v722_v1 = vmax.f32 %v720_v0, 0.0 }
 0x16b   : > { %759 = vmatmul.f32.vlgmr.msra.gmra.mxu0 %v722_v1 }
 0x1e0   : > { %v688_v3 = vpop.f32.mrf.mxu3 }
 0x1e1   : > { %v689_v5 = vadd.f32 %v1083_v2, %v688_v3 }
 0x1e3   : > { %v767_v6 = vadd.f32 %v763_v4, %v689_v5 }
 0x1e5   : > { %768 = vadd.xlane.f32.xlu0 %v767_v6 }
 0x1e8   : > { %v760_v8 = vpop.f32.mrf.mxu0 }
 0x1e9   : > { %v761_v10 = vadd.f32 %v1084_v7, %v760_v8 }
 0x1eb   : > { %v803_v11 = vadd.f32 %v764_v9, %v761_v10 }
 0x1ed   : > { %804 = vadd.xlane.f32.xlu0 %v803_v11 }
 0x258   : > { %v769_v19 = vpop.xlane.xlu0 %768 }
 0x259   : > { %v777_v20 = vmul.f32 %v776_v18, %v769_v19 }
 0x25b   : > { %v778_v21 = vsub.f32 %v767_v6, %v777_v20 }
 0x25d   : > { %v779_v22 = vmul.f32 %v778_v21, %v778_v21 }
 0x25f   : > { %780 = vadd.xlane.f32.xlu1 %v779_v22 }
 0x260   : > { %v805_v23 = vpop.xlane.xlu0 %804 }
 0x261   : > { %v806_v24 = vmul.f32 %v805_v23, %v776_v18 }
 0x263   : > { %v807_v25 = vsub.f32 %v803_v11, %v806_v24 }
 0x265   : > { %v808_v26 = vmul.f32 %v807_v25, %v807_v25 }
 0x267   : > { %809 = vadd.xlane.f32.xlu1 %v808_v26 }
 0x2d2   : > { %v781_v27 = vpop.xlane.xlu1 %780 }
 0x2d3   : > { %v782_v28 = vmul.f32 %v781_v27, %v776_v18 }
 0x2d5   : > { %v783_v29 = vadd.f32 1e-05, %v782_v28 }
 0x2d7   : > { %1089 = vrsqrt.f32 %v783_v29  ;;  %vm790_vm3 = vweird.f32 %v783_v29 }
 0x2da   : > { %v810_v30 = vpop.xlane.xlu1 %809 }
 0x2db   : > { %v811_v31 = vmul.f32 %v810_v30, %v776_v18 }
 0x2dd   : > { %v1090_v32 = vpop.eup %1089  ;;  %v812_v33 = vadd.f32 1e-05, %v811_v31 }
 0x2de   : > { %v785_v34 = vmul.f32 %v1090_v32, %v783_v29  ;;  %vm791_vm2 = vweird.f32 %v1090_v32 }
 0x2df   : > { %1091 = vrsqrt.f32 %v812_v33  ;;  %vm792_vm4 = vmor %vm790_vm3, %vm791_vm2  ;;  %vm819_vm6 = vweird.f32 %v812_v33 }
 0x2e0   : > { %v786_v35 = vmul.f32 %v1090_v32, %v785_v34 }
 0x2e2   : > { %v787_v36 = vmul.f32 0.5, %v786_v35 }
 0x2e4   : > { %v788_v37 = vsub.f32 1.5, %v787_v36 }
 0x2e5   : > { %v1092_v38 = vpop.eup %1091 }
 0x2e6   : > { %v789_v39 = vmul.f32 %v1090_v32, %v788_v37  ;;  %v814_v40 = vmul.f32 %v1092_v38, %v812_v33  ;;  %vm820_vm5 = vweird.f32 %v1092_v38 }
 0x2e7   : > { %vm821_vm7 = vmor %vm819_vm6, %vm820_vm5 }
 0x2e8   : > { %v793_v42 = vsel %vm792_vm4, %v1090_v32, %v789_v39  ;;  %v815_v43 = vmul.f32 %v1092_v38, %v814_v40 }
 0x2e9   : > { %v794_v45 = vmul.f32 %v793_v42, %v778_v21 }
 0x2ea   : > { %v816_v46 = vmul.f32 0.5, %v815_v43 }
 0x2eb   : > { %v798_v47 = vmul.f32 %v1085_v41, %v794_v45 }
 0x2ec   : > { %v817_v48 = vsub.f32 1.5, %v816_v46 }
 0x2ed   : > { %v802_v49 = vadd.f32 %v1086_v44, %v798_v47 }
 0x2ee   : > { %v818_v50 = vmul.f32 %v1092_v38, %v817_v48 }
 0x2ef   : > { %826 = vst [vmem:[%s559_s23] sm:$0x1] %v802_v49 }
 0x2f0   : > { %v822_v51 = vsel %vm821_vm7, %v1092_v38, %v818_v50 }
 0x2f1   : > { %v823_v52 = vmul.f32 %v822_v51, %v807_v25 }
 0x2f3   : > { %v824_v53 = vmul.f32 %v1085_v41, %v823_v52 }
 0x2f5   : > { %v825_v54 = vadd.f32 %v1086_v44, %v824_v53 }
 0x2f7   : > { %827 = vst [vmem:[%s559_s23 + $0x1] sm:$0xf] %v825_v54 }
 0x2f8 PF: > { %p26_p3 = scmp.ge.s32.totalorder %s1504_s1, 4   ;;  %s1631_s25 = smov %s1341_s26 }
 0x2f9   : > { %s1632_s26 = smov %s1345_s27  ;;  %s1633_s27 = smov %s1515_s17 }
 0x2fa   : > { %s1634_s28 = smov %s1504_s1  ;;  %28 = sbr.rel (!%p26_p3) target bundleno = 13 (0xd), region = 136 }
 0x2ff   :  { %847 = vsyncpa [#allocation3], 1 }
 0x300   :  { %849 = vsyncpa [#allocation3 + $0x1], 1 }
 0x301   :  { %850 = vsyncpa [#allocation5], 1 }
 0x302   :  { %851 = vsyncpa [#allocation8], 1 }
 0x303   :  { %852 = vsyncpa [#allocation11], 1 }

</bundles_post_ra>
